<compile_context>
chip_gen: v6e
topology: v6e:2x2x1
jax: 0.10.0
libtpu: 0.0.40
codegen_flags: <defaults>
</compile_context>

<pallas_src>
import jax
import jax.numpy as jnp
from jax.experimental import pallas as pl
from jax.experimental.pallas import tpu as pltpu

EPS = 1e-5


# ---------------- Pallas kernels ----------------

def _conv_bn_up_kernel(cols_ref, w_ref, s_ref, b_ref, u_ref, o_ref):
    # cols_ref: (1, 9*Cin, H*W)   transposed im2col slab for one batch element
    # w_ref:    (Cout, 9*Cin)     conv weights, tap order (dy, dx, cin)
    # s_ref/b_ref: (Cout, 1)      folded BatchNorm scale / bias
    # u_ref:    (H*W, 4*H*W)      kron(Uy, Ux)^T bilinear x2 upsample matrix
    # o_ref:    (1, Cout, 4*H*W)  upsampled feature map, channels-first flat
    y = jnp.dot(w_ref[...], cols_ref[0],
                preferred_element_type=jnp.float32)               # (Cout, H*W)
    y = y * s_ref[...] + b_ref[...]                               # folded BN
    o_ref[0] = jnp.dot(y, u_ref[...],
                       preferred_element_type=jnp.float32)        # (Cout, 4*H*W)


def _attn_kernel(x_ref, o_ref):
    # x_ref/o_ref: (1, C, H, W).  Per channel: S = X X^T, row softmax, O = P X.
    x = x_ref[0]                                                  # (C, H, W)
    s = jnp.einsum('caw,cbw->cab', x, x,
                   preferred_element_type=jnp.float32)            # (C, H, H)
    s = s - jnp.max(s, axis=-1, keepdims=True)
    p = jnp.exp(s)
    p = p * pl.reciprocal(jnp.sum(p, axis=-1, keepdims=True), approx=True)
    o_ref[0] = jnp.einsum('cab,cbw->caw', p, x,
                          preferred_element_type=jnp.float32)


# ---------------- wrappers ----------------

def _interp_matrix(n):
    # (2n, n) interpolation matrix for bilinear x2 with align_corners=True.
    m = 2 * n
    if n == 1:
        return jnp.ones((m, 1), jnp.float32)
    src = jnp.arange(m, dtype=jnp.float32) * (n - 1) / (m - 1)
    i0 = jnp.clip(jnp.floor(src).astype(jnp.int32), 0, n - 2)
    i1 = i0 + 1
    w1 = src - i0.astype(jnp.float32)
    eye = jnp.eye(n, dtype=jnp.float32)
    return eye[i0] * (1.0 - w1)[:, None] + eye[i1] * w1[:, None]


def _upsample_kron(h, w):
    # (H*W, 4*H*W) matrix U with  X_flat @ U == vec(Uy @ X2d @ Ux^T).
    uy = _interp_matrix(h)                     # (2H, H)
    ux = _interp_matrix(w)                     # (2W, W)
    return jnp.einsum('ih,jw->hwij', uy, ux).reshape(h * w, 4 * h * w)


def conv_bn_upsample2(x_nchw, w_hwio, eff_scale, eff_bias):
    """Fused 3x3 'same' conv + folded BN + bilinear x2 upsample.  NCHW->NCHW."""
    B, Cin, H, W = x_nchw.shape
    Cout = w_hwio.shape[-1]
    K = 9 * Cin
    # Transposed im2col, channels-first (no NCHW<->NHWC transpose):
    #   cols[b, (dy*3+dx)*Cin + c, h*W + w] = x_pad[b, c, h+dy, w+dx]
    xp = jnp.pad(x_nchw, ((0, 0), (0, 0), (1, 1), (1, 1)))
    cols = jnp.concatenate(
        [xp[:, :, dy:dy + H, dx:dx + W] for dy in range(3) for dx in range(3)],
        axis=1).reshape(B, K, H * W)
    w_mat = w_hwio.reshape(K, Cout).T          # (Cout, K), tap order (dy,dx,cin)
    u = _upsample_kron(H, W)                   # (H*W, 4*H*W)
    out = pl.pallas_call(
        _conv_bn_up_kernel,
        out_shape=jax.ShapeDtypeStruct((B, Cout, 4 * H * W), jnp.float32),
        grid=(B,),
        in_specs=[pl.BlockSpec((1, K, H * W), lambda b: (b, 0, 0)),
                  pl.BlockSpec((Cout, K), lambda b: (0, 0)),
                  pl.BlockSpec((Cout, 1), lambda b: (0, 0)),
                  pl.BlockSpec((Cout, 1), lambda b: (0, 0)),
                  pl.BlockSpec((H * W, 4 * H * W), lambda b: (0, 0))],
        out_specs=pl.BlockSpec((1, Cout, 4 * H * W), lambda b: (b, 0, 0)),
        compiler_params=pltpu.CompilerParams(
            dimension_semantics=("parallel",)),
    )(cols, w_mat, eff_scale[:, None], eff_bias[:, None], u)
    return out.reshape(B, Cout, 2 * H, 2 * W)


def self_attention_map(x_nchw):
    B, C, H, W = x_nchw.shape
    return pl.pallas_call(
        _attn_kernel,
        out_shape=jax.ShapeDtypeStruct((B, C, H, W), jnp.float32),
        grid=(B,),
        in_specs=[pl.BlockSpec((1, C, H, W), lambda b: (b, 0, 0, 0))],
        out_specs=pl.BlockSpec((1, C, H, W), lambda b: (b, 0, 0, 0)),
        compiler_params=pltpu.CompilerParams(
            dimension_semantics=("parallel",)),
    )(x_nchw.astype(jnp.float32))


# ---------------- module parameters & forward ----------------

def init_ca_params(in_dim, key):
    # conv1_rgb, conv1_dep, conv2_dep (layer_ful2 is unused in forward()).
    dims = [(in_dim, in_dim // 2),
            (in_dim // 2, in_dim // 4),
            (in_dim // 4, in_dim // 8)]
    params = []
    for (cin, cout) in dims:
        key, k1, k2, k3, k4, k5, k6 = jax.random.split(key, 7)
        w = 0.1 * jax.random.normal(k1, (3, 3, cin, cout), jnp.float32)   # HWIO
        b = 0.1 * jax.random.normal(k2, (cout,), jnp.float32)
        gamma = 1.0 + 0.1 * jax.random.normal(k3, (cout,), jnp.float32)
        beta = 0.1 * jax.random.normal(k4, (cout,), jnp.float32)
        mean = 0.1 * jax.random.normal(k5, (cout,), jnp.float32)
        var = 1.0 + 0.1 * jnp.abs(jax.random.normal(k6, (cout,), jnp.float32))
        eff_scale = gamma / jnp.sqrt(var + EPS)
        eff_bias = (b - mean) * eff_scale + beta
        params.append({"w": w, "scale": eff_scale, "bias": eff_bias})
    return params


def ca_forward(co0, co1, co2, co3, params):
    p1, p2, p3 = params
    c3 = conv_bn_upsample2(co3.astype(jnp.float32),
                           p1["w"], p1["scale"], p1["bias"])
    c2 = conv_bn_upsample2(c3 + co2.astype(jnp.float32),
                           p2["w"], p2["scale"], p2["bias"])
    c1 = conv_bn_upsample2(c2 + co1.astype(jnp.float32),
                           p3["w"], p3["scale"], p3["bias"])
    mm_cat2 = jnp.concatenate([c1, co0.astype(jnp.float32)], axis=1)
    return self_attention_map(mm_cat2)


if __name__ == "__main__":
    in_dim, B, H3, W3 = 16, 2, 4, 4
    params = init_ca_params(in_dim, jax.random.PRNGKey(0))

    k0, k1, k2, k3 = jax.random.split(jax.random.PRNGKey(0), 4)
    co3 = jax.random.normal(k3, (B, in_dim,       H3,     W3),     jnp.float32)
    co2 = jax.random.normal(k2, (B, in_dim // 2,  2 * H3, 2 * W3), jnp.float32)
    co1 = jax.random.normal(k1, (B, in_dim // 4,  4 * H3, 4 * W3), jnp.float32)
    co0 = jax.random.normal(k0, (B, in_dim // 8,  8 * H3, 8 * W3), jnp.float32)

    fwd = jax.jit(ca_forward)
    out = jax.block_until_ready(fwd(co0, co1, co2, co3, params))
    assert out.shape == (B, in_dim // 4, 8 * H3, 8 * W3)
    assert bool(jnp.all(jnp.isfinite(out)))
    print("KERNEL_OK")
</pallas_src>

<mosaic_0001>
module attributes {stable_mosaic.version = 11 : i64} {
  func.func @_conv_bn_up_kernel(%arg0: i32, %arg1: memref<1x144x16xf32, #tpu.memory_space<vmem>>, %arg2: memref<8x144xf32, #tpu.memory_space<vmem>>, %arg3: memref<8x1xf32, #tpu.memory_space<vmem>>, %arg4: memref<8x1xf32, #tpu.memory_space<vmem>>, %arg5: memref<16x64xf32, #tpu.memory_space<vmem>>, %arg6: memref<1x8x64xf32, #tpu.memory_space<vmem>>) attributes {dimension_semantics = [#tpu.dimension_semantics<parallel>], iteration_bounds = array<i64: 2>, scalar_prefetch = 0 : i64, scratch_operands = 0 : i64, tpu.core_type = #tpu.core_type<tc>, window_params = [{transform_indices = @transform_0, window_bounds = array<i64: 1, 144, 16>}, {pipeline_mode = #tpu.pipeline_mode<synchronous>, transform_indices = @transform_1, window_bounds = array<i64: 8, 144>}, {pipeline_mode = #tpu.pipeline_mode<synchronous>, transform_indices = @transform_2, window_bounds = array<i64: 8, 1>}, {pipeline_mode = #tpu.pipeline_mode<synchronous>, transform_indices = @transform_3, window_bounds = array<i64: 8, 1>}, {pipeline_mode = #tpu.pipeline_mode<synchronous>, transform_indices = @transform_4, window_bounds = array<i64: 16, 64>}, {transform_indices = @transform_5, window_bounds = array<i64: 1, 8, 64>}]} {
    %c0 = arith.constant 0 : index
    %c0_0 = arith.constant 0 : index
    %0 = vector.load %arg2[%c0, %c0_0] : memref<8x144xf32, #tpu.memory_space<vmem>>, vector<8x144xf32>
    %c0_1 = arith.constant 0 : index
    %c0_2 = arith.constant 0 : index
    %c0_3 = arith.constant 0 : index
    %1 = vector.load %arg1[%c0_1, %c0_2, %c0_3] : memref<1x144x16xf32, #tpu.memory_space<vmem>>, vector<1x144x16xf32>
    %2 = vector.shape_cast %1 : vector<1x144x16xf32> to vector<144x16xf32>
    %cst = arith.constant dense<0.000000e+00> : vector<8x16xf32>
    %3 = tpu.matmul %0, %2, %cst {dimension_numbers = #tpu.dot_dimension_numbers<[1], [0], [0], [1], [0, 0, 1, 1], [], []>} : vector<8x144xf32>, vector<144x16xf32>, vector<8x16xf32> -> vector<8x16xf32>
    %c0_4 = arith.constant 0 : index
    %c0_5 = arith.constant 0 : index
    %4 = vector.load %arg3[%c0_4, %c0_5] : memref<8x1xf32, #tpu.memory_space<vmem>>, vector<8x1xf32>
    %5 = vector.broadcast %4 : vector<8x1xf32> to vector<8x16xf32>
    %6 = arith.mulf %3, %5 : vector<8x16xf32>
    %c0_6 = arith.constant 0 : index
    %c0_7 = arith.constant 0 : index
    %7 = vector.load %arg4[%c0_6, %c0_7] : memref<8x1xf32, #tpu.memory_space<vmem>>, vector<8x1xf32>
    %8 = vector.broadcast %7 : vector<8x1xf32> to vector<8x16xf32>
    %9 = arith.addf %6, %8 : vector<8x16xf32>
    %c0_8 = arith.constant 0 : index
    %c0_9 = arith.constant 0 : index
    %10 = vector.load %arg5[%c0_8, %c0_9] : memref<16x64xf32, #tpu.memory_space<vmem>>, vector<16x64xf32>
    %cst_10 = arith.constant dense<0.000000e+00> : vector<8x64xf32>
    %11 = tpu.matmul %9, %10, %cst_10 {dimension_numbers = #tpu.dot_dimension_numbers<[1], [0], [0], [1], [0, 0, 1, 1], [], []>} : vector<8x16xf32>, vector<16x64xf32>, vector<8x64xf32> -> vector<8x64xf32>
    %c0_11 = arith.constant 0 : index
    %c0_12 = arith.constant 0 : index
    %c0_13 = arith.constant 0 : index
    %12 = vector.load %arg6[%c0_11, %c0_12, %c0_13] : memref<1x8x64xf32, #tpu.memory_space<vmem>>, vector<1x8x64xf32>
    %13 = vector.shape_cast %12 : vector<1x8x64xf32> to vector<8x64xf32>
    %14 = vector.shape_cast %11 : vector<8x64xf32> to vector<1x8x64xf32>
    tpu.vector_store %arg6[%c0_11, %c0_12, %c0_13], %14 {strides = array<i32>} : memref<1x8x64xf32, #tpu.memory_space<vmem>>, vector<1x8x64xf32>,
    return
  }
  func.func @transform_0(%arg0: i32) -> (i32, i32, i32) {
    %c0_i32 = arith.constant 0 : i32
    %c0_i32_0 = arith.constant 0 : i32
    %c0_i32_1 = arith.constant 0 : i32
    return %arg0, %c0_i32, %c0_i32_0 : i32, i32, i32
  }
  func.func @transform_1(%arg0: i32) -> (i32, i32) {
    %c0_i32 = arith.constant 0 : i32
    %c0_i32_0 = arith.constant 0 : i32
    %c0_i32_1 = arith.constant 0 : i32
    return %c0_i32, %c0_i32_0 : i32, i32
  }
  func.func @transform_2(%arg0: i32) -> (i32, i32) {
    %c0_i32 = arith.constant 0 : i32
    %c0_i32_0 = arith.constant 0 : i32
    %c0_i32_1 = arith.constant 0 : i32
    return %c0_i32, %c0_i32_0 : i32, i32
  }
  func.func @transform_3(%arg0: i32) -> (i32, i32) {
    %c0_i32 = arith.constant 0 : i32
    %c0_i32_0 = arith.constant 0 : i32
    %c0_i32_1 = arith.constant 0 : i32
    return %c0_i32, %c0_i32_0 : i32, i32
  }
  func.func @transform_4(%arg0: i32) -> (i32, i32) {
    %c0_i32 = arith.constant 0 : i32
    %c0_i32_0 = arith.constant 0 : i32
    %c0_i32_1 = arith.constant 0 : i32
    return %c0_i32, %c0_i32_0 : i32, i32
  }
  func.func @transform_5(%arg0: i32) -> (i32, i32, i32) {
    %c0_i32 = arith.constant 0 : i32
    %c0_i32_0 = arith.constant 0 : i32
    %c0_i32_1 = arith.constant 0 : i32
    return %arg0, %c0_i32, %c0_i32_0 : i32, i32, i32
  }
}

module attributes {stable_mosaic.version = 11 : i64} {
  func.func @_conv_bn_up_kernel(%arg0: i32, %arg1: memref<1x72x64xf32, #tpu.memory_space<vmem>>, %arg2: memref<4x72xf32, #tpu.memory_space<vmem>>, %arg3: memref<4x1xf32, #tpu.memory_space<vmem>>, %arg4: memref<4x1xf32, #tpu.memory_space<vmem>>, %arg5: memref<64x256xf32, #tpu.memory_space<vmem>>, %arg6: memref<1x4x256xf32, #tpu.memory_space<vmem>>) attributes {dimension_semantics = [#tpu.dimension_semantics<parallel>], iteration_bounds = array<i64: 2>, scalar_prefetch = 0 : i64, scratch_operands = 0 : i64, tpu.core_type = #tpu.core_type<tc>, window_params = [{transform_indices = @transform_0, window_bounds = array<i64: 1, 72, 64>}, {pipeline_mode = #tpu.pipeline_mode<synchronous>, transform_indices = @transform_1, window_bounds = array<i64: 4, 72>}, {pipeline_mode = #tpu.pipeline_mode<synchronous>, transform_indices = @transform_2, window_bounds = array<i64: 4, 1>}, {pipeline_mode = #tpu.pipeline_mode<synchronous>, transform_indices = @transform_3, window_bounds = array<i64: 4, 1>}, {pipeline_mode = #tpu.pipeline_mode<synchronous>, transform_indices = @transform_4, window_bounds = array<i64: 64, 256>}, {transform_indices = @transform_5, window_bounds = array<i64: 1, 4, 256>}]} {
    %c0 = arith.constant 0 : index
    %c0_0 = arith.constant 0 : index
    %0 = vector.load %arg2[%c0, %c0_0] : memref<4x72xf32, #tpu.memory_space<vmem>>, vector<4x72xf32>
    %c0_1 = arith.constant 0 : index
    %c0_2 = arith.constant 0 : index
    %c0_3 = arith.constant 0 : index
    %1 = vector.load %arg1[%c0_1, %c0_2, %c0_3] : memref<1x72x64xf32, #tpu.memory_space<vmem>>, vector<1x72x64xf32>
    %2 = vector.shape_cast %1 : vector<1x72x64xf32> to vector<72x64xf32>
    %cst = arith.constant dense<0.000000e+00> : vector<4x64xf32>
    %3 = tpu.matmul %0, %2, %cst {dimension_numbers = #tpu.dot_dimension_numbers<[1], [0], [0], [1], [0, 0, 1, 1], [], []>} : vector<4x72xf32>, vector<72x64xf32>, vector<4x64xf32> -> vector<4x64xf32>
    %c0_4 = arith.constant 0 : index
    %c0_5 = arith.constant 0 : index
    %4 = vector.load %arg3[%c0_4, %c0_5] : memref<4x1xf32, #tpu.memory_space<vmem>>, vector<4x1xf32>
    %5 = vector.broadcast %4 : vector<4x1xf32> to vector<4x64xf32>
    %6 = arith.mulf %3, %5 : vector<4x64xf32>
    %c0_6 = arith.constant 0 : index
    %c0_7 = arith.constant 0 : index
    %7 = vector.load %arg4[%c0_6, %c0_7] : memref<4x1xf32, #tpu.memory_space<vmem>>, vector<4x1xf32>
    %8 = vector.broadcast %7 : vector<4x1xf32> to vector<4x64xf32>
    %9 = arith.addf %6, %8 : vector<4x64xf32>
    %c0_8 = arith.constant 0 : index
    %c0_9 = arith.constant 0 : index
    %10 = vector.load %arg5[%c0_8, %c0_9] : memref<64x256xf32, #tpu.memory_space<vmem>>, vector<64x256xf32>
    %cst_10 = arith.constant dense<0.000000e+00> : vector<4x256xf32>
    %11 = tpu.matmul %9, %10, %cst_10 {dimension_numbers = #tpu.dot_dimension_numbers<[1], [0], [0], [1], [0, 0, 1, 1], [], []>} : vector<4x64xf32>, vector<64x256xf32>, vector<4x256xf32> -> vector<4x256xf32>
    %c0_11 = arith.constant 0 : index
    %c0_12 = arith.constant 0 : index
    %c0_13 = arith.constant 0 : index
    %12 = vector.load %arg6[%c0_11, %c0_12, %c0_13] : memref<1x4x256xf32, #tpu.memory_space<vmem>>, vector<1x4x256xf32>
    %13 = vector.shape_cast %12 : vector<1x4x256xf32> to vector<4x256xf32>
    %14 = vector.shape_cast %11 : vector<4x256xf32> to vector<1x4x256xf32>
    tpu.vector_store %arg6[%c0_11, %c0_12, %c0_13], %14 {strides = array<i32>} : memref<1x4x256xf32, #tpu.memory_space<vmem>>, vector<1x4x256xf32>,
    return
  }
  func.func @transform_0(%arg0: i32) -> (i32, i32, i32) {
    %c0_i32 = arith.constant 0 : i32
    %c0_i32_0 = arith.constant 0 : i32
    %c0_i32_1 = arith.constant 0 : i32
    return %arg0, %c0_i32, %c0_i32_0 : i32, i32, i32
  }
  func.func @transform_1(%arg0: i32) -> (i32, i32) {
    %c0_i32 = arith.constant 0 : i32
    %c0_i32_0 = arith.constant 0 : i32
    %c0_i32_1 = arith.constant 0 : i32
    return %c0_i32, %c0_i32_0 : i32, i32
  }
  func.func @transform_2(%arg0: i32) -> (i32, i32) {
    %c0_i32 = arith.constant 0 : i32
    %c0_i32_0 = arith.constant 0 : i32
    %c0_i32_1 = arith.constant 0 : i32
    return %c0_i32, %c0_i32_0 : i32, i32
  }
  func.func @transform_3(%arg0: i32) -> (i32, i32) {
    %c0_i32 = arith.constant 0 : i32
    %c0_i32_0 = arith.constant 0 : i32
    %c0_i32_1 = arith.constant 0 : i32
    return %c0_i32, %c0_i32_0 : i32, i32
  }
  func.func @transform_4(%arg0: i32) -> (i32, i32) {
    %c0_i32 = arith.constant 0 : i32
    %c0_i32_0 = arith.constant 0 : i32
    %c0_i32_1 = arith.constant 0 : i32
    return %c0_i32, %c0_i32_0 : i32, i32
  }
  func.func @transform_5(%arg0: i32) -> (i32, i32, i32) {
    %c0_i32 = arith.constant 0 : i32
    %c0_i32_0 = arith.constant 0 : i32
    %c0_i32_1 = arith.constant 0 : i32
    return %arg0, %c0_i32, %c0_i32_0 : i32, i32, i32
  }
}

module attributes {stable_mosaic.version = 11 : i64} {
  func.func @_conv_bn_up_kernel(%arg0: i32, %arg1: memref<1x36x256xf32, #tpu.memory_space<vmem>>, %arg2: memref<2x36xf32, #tpu.memory_space<vmem>>, %arg3: memref<2x1xf32, #tpu.memory_space<vmem>>, %arg4: memref<2x1xf32, #tpu.memory_space<vmem>>, %arg5: memref<256x1024xf32, #tpu.memory_space<vmem>>, %arg6: memref<1x2x1024xf32, #tpu.memory_space<vmem>>) attributes {dimension_semantics = [#tpu.dimension_semantics<parallel>], iteration_bounds = array<i64: 2>, scalar_prefetch = 0 : i64, scratch_operands = 0 : i64, tpu.core_type = #tpu.core_type<tc>, window_params = [{transform_indices = @transform_0, window_bounds = array<i64: 1, 36, 256>}, {pipeline_mode = #tpu.pipeline_mode<synchronous>, transform_indices = @transform_1, window_bounds = array<i64: 2, 36>}, {pipeline_mode = #tpu.pipeline_mode<synchronous>, transform_indices = @transform_2, window_bounds = array<i64: 2, 1>}, {pipeline_mode = #tpu.pipeline_mode<synchronous>, transform_indices = @transform_3, window_bounds = array<i64: 2, 1>}, {pipeline_mode = #tpu.pipeline_mode<synchronous>, transform_indices = @transform_4, window_bounds = array<i64: 256, 1024>}, {transform_indices = @transform_5, window_bounds = array<i64: 1, 2, 1024>}]} {
    %c0 = arith.constant 0 : index
    %c0_0 = arith.constant 0 : index
    %0 = vector.load %arg2[%c0, %c0_0] : memref<2x36xf32, #tpu.memory_space<vmem>>, vector<2x36xf32>
    %c0_1 = arith.constant 0 : index
    %c0_2 = arith.constant 0 : index
    %c0_3 = arith.constant 0 : index
    %1 = vector.load %arg1[%c0_1, %c0_2, %c0_3] : memref<1x36x256xf32, #tpu.memory_space<vmem>>, vector<1x36x256xf32>
    %2 = vector.shape_cast %1 : vector<1x36x256xf32> to vector<36x256xf32>
    %cst = arith.constant dense<0.000000e+00> : vector<2x256xf32>
    %3 = tpu.matmul %0, %2, %cst {dimension_numbers = #tpu.dot_dimension_numbers<[1], [0], [0], [1], [0, 0, 1, 1], [], []>} : vector<2x36xf32>, vector<36x256xf32>, vector<2x256xf32> -> vector<2x256xf32>
    %c0_4 = arith.constant 0 : index
    %c0_5 = arith.constant 0 : index
    %4 = vector.load %arg3[%c0_4, %c0_5] : memref<2x1xf32, #tpu.memory_space<vmem>>, vector<2x1xf32>
    %5 = vector.broadcast %4 : vector<2x1xf32> to vector<2x256xf32>
    %6 = arith.mulf %3, %5 : vector<2x256xf32>
    %c0_6 = arith.constant 0 : index
    %c0_7 = arith.constant 0 : index
    %7 = vector.load %arg4[%c0_6, %c0_7] : memref<2x1xf32, #tpu.memory_space<vmem>>, vector<2x1xf32>
    %8 = vector.broadcast %7 : vector<2x1xf32> to vector<2x256xf32>
    %9 = arith.addf %6, %8 : vector<2x256xf32>
    %c0_8 = arith.constant 0 : index
    %c0_9 = arith.constant 0 : index
    %10 = vector.load %arg5[%c0_8, %c0_9] : memref<256x1024xf32, #tpu.memory_space<vmem>>, vector<256x1024xf32>
    %cst_10 = arith.constant dense<0.000000e+00> : vector<2x1024xf32>
    %11 = tpu.matmul %9, %10, %cst_10 {dimension_numbers = #tpu.dot_dimension_numbers<[1], [0], [0], [1], [0, 0, 1, 1], [], []>} : vector<2x256xf32>, vector<256x1024xf32>, vector<2x1024xf32> -> vector<2x1024xf32>
    %c0_11 = arith.constant 0 : index
    %c0_12 = arith.constant 0 : index
    %c0_13 = arith.constant 0 : index
    %12 = vector.load %arg6[%c0_11, %c0_12, %c0_13] : memref<1x2x1024xf32, #tpu.memory_space<vmem>>, vector<1x2x1024xf32>
    %13 = vector.shape_cast %12 : vector<1x2x1024xf32> to vector<2x1024xf32>
    %14 = vector.shape_cast %11 : vector<2x1024xf32> to vector<1x2x1024xf32>
    tpu.vector_store %arg6[%c0_11, %c0_12, %c0_13], %14 {strides = array<i32>} : memref<1x2x1024xf32, #tpu.memory_space<vmem>>, vector<1x2x1024xf32>,
    return
  }
  func.func @transform_0(%arg0: i32) -> (i32, i32, i32) {
    %c0_i32 = arith.constant 0 : i32
    %c0_i32_0 = arith.constant 0 : i32
    %c0_i32_1 = arith.constant 0 : i32
    return %arg0, %c0_i32, %c0_i32_0 : i32, i32, i32
  }
  func.func @transform_1(%arg0: i32) -> (i32, i32) {
    %c0_i32 = arith.constant 0 : i32
    %c0_i32_0 = arith.constant 0 : i32
    %c0_i32_1 = arith.constant 0 : i32
    return %c0_i32, %c0_i32_0 : i32, i32
  }
  func.func @transform_2(%arg0: i32) -> (i32, i32) {
    %c0_i32 = arith.constant 0 : i32
    %c0_i32_0 = arith.constant 0 : i32
    %c0_i32_1 = arith.constant 0 : i32
    return %c0_i32, %c0_i32_0 : i32, i32
  }
  func.func @transform_3(%arg0: i32) -> (i32, i32) {
    %c0_i32 = arith.constant 0 : i32
    %c0_i32_0 = arith.constant 0 : i32
    %c0_i32_1 = arith.constant 0 : i32
    return %c0_i32, %c0_i32_0 : i32, i32
  }
  func.func @transform_4(%arg0: i32) -> (i32, i32) {
    %c0_i32 = arith.constant 0 : i32
    %c0_i32_0 = arith.constant 0 : i32
    %c0_i32_1 = arith.constant 0 : i32
    return %c0_i32, %c0_i32_0 : i32, i32
  }
  func.func @transform_5(%arg0: i32) -> (i32, i32, i32) {
    %c0_i32 = arith.constant 0 : i32
    %c0_i32_0 = arith.constant 0 : i32
    %c0_i32_1 = arith.constant 0 : i32
    return %arg0, %c0_i32, %c0_i32_0 : i32, i32, i32
  }
}

module attributes {stable_mosaic.version = 11 : i64} {
  func.func @_attn_kernel(%arg0: i32, %arg1: memref<1x4x32x32xf32, #tpu.memory_space<vmem>>, %arg2: memref<1x4x32x32xf32, #tpu.memory_space<vmem>>) attributes {dimension_semantics = [#tpu.dimension_semantics<parallel>], iteration_bounds = array<i64: 2>, scalar_prefetch = 0 : i64, scratch_operands = 0 : i64, tpu.core_type = #tpu.core_type<tc>, window_params = [{transform_indices = @transform_0, window_bounds = array<i64: 1, 4, 32, 32>}, {transform_indices = @transform_1, window_bounds = array<i64: 1, 4, 32, 32>}]} {
    %c0 = arith.constant 0 : index
    %c0_0 = arith.constant 0 : index
    %c0_1 = arith.constant 0 : index
    %c0_2 = arith.constant 0 : index
    %0 = vector.load %arg1[%c0, %c0_0, %c0_1, %c0_2] : memref<1x4x32x32xf32, #tpu.memory_space<vmem>>, vector<1x4x32x32xf32>
    %1 = vector.shape_cast %0 : vector<1x4x32x32xf32> to vector<4x32x32xf32>
    "tpu.trace_start"() <{level = 10 : i32, message = "caw,cbw->cab"}> : () -> ()
    %cst = arith.constant dense<0.000000e+00> : vector<4x32x32xf32>
    %2 = tpu.matmul %1, %1, %cst {dimension_numbers = #tpu.dot_dimension_numbers<[2], [2], [1], [1], [0, 0, 0, 1, 1, 1], [0], [0]>} : vector<4x32x32xf32>, vector<4x32x32xf32>, vector<4x32x32xf32> -> vector<4x32x32xf32>
    "tpu.trace_stop"() : () -> ()
    %cst_3 = arith.constant dense<0xFF800000> : vector<4x32xf32>
    %3 = vector.multi_reduction <maximumf>, %2, %cst_3 [2] : vector<4x32x32xf32> to vector<4x32xf32>
    %4 = vector.shape_cast %3 : vector<4x32xf32> to vector<4x32x1xf32>
    %5 = vector.broadcast %4 : vector<4x32x1xf32> to vector<4x32x32xf32>
    %6 = arith.subf %2, %5 : vector<4x32x32xf32>
    %7 = math.exp %6 : vector<4x32x32xf32>
    %cst_4 = arith.constant dense<0.000000e+00> : vector<4x32xf32>
    %8 = vector.multi_reduction <add>, %7, %cst_4 [2] : vector<4x32x32xf32> to vector<4x32xf32>
    %9 = vector.shape_cast %8 : vector<4x32xf32> to vector<4x32x1xf32>
    %10 = tpu.reciprocal %9 {approx = true} : vector<4x32x1xf32> -> vector<4x32x1xf32>
    %11 = vector.broadcast %10 : vector<4x32x1xf32> to vector<4x32x32xf32>
    %12 = arith.mulf %7, %11 : vector<4x32x32xf32>
    "tpu.trace_start"() <{level = 10 : i32, message = "cab,cbw->caw"}> : () -> ()
    %cst_5 = arith.constant dense<0.000000e+00> : vector<4x32x32xf32>
    %13 = tpu.matmul %12, %1, %cst_5 {dimension_numbers = #tpu.dot_dimension_numbers<[2], [1], [1], [2], [0, 0, 0, 1, 1, 2], [0], [0]>} : vector<4x32x32xf32>, vector<4x32x32xf32>, vector<4x32x32xf32> -> vector<4x32x32xf32>
    "tpu.trace_stop"() : () -> ()
    %c0_6 = arith.constant 0 : index
    %c0_7 = arith.constant 0 : index
    %c0_8 = arith.constant 0 : index
    %c0_9 = arith.constant 0 : index
    %14 = vector.load %arg2[%c0_6, %c0_7, %c0_8, %c0_9] : memref<1x4x32x32xf32, #tpu.memory_space<vmem>>, vector<1x4x32x32xf32>
    %15 = vector.shape_cast %14 : vector<1x4x32x32xf32> to vector<4x32x32xf32>
    %16 = vector.shape_cast %13 : vector<4x32x32xf32> to vector<1x4x32x32xf32>
    tpu.vector_store %arg2[%c0_6, %c0_7, %c0_8, %c0_9], %16 {strides = array<i32>} : memref<1x4x32x32xf32, #tpu.memory_space<vmem>>, vector<1x4x32x32xf32>,
    return
  }
  func.func @transform_0(%arg0: i32) -> (i32, i32, i32, i32) {
    %c0_i32 = arith.constant 0 : i32
    %c0_i32_0 = arith.constant 0 : i32
    %c0_i32_1 = arith.constant 0 : i32
    %c0_i32_2 = arith.constant 0 : i32
    return %arg0, %c0_i32, %c0_i32_0, %c0_i32_1 : i32, i32, i32, i32
  }
  func.func @transform_1(%arg0: i32) -> (i32, i32, i32, i32) {
    %c0_i32 = arith.constant 0 : i32
    %c0_i32_0 = arith.constant 0 : i32
    %c0_i32_1 = arith.constant 0 : i32
    %c0_i32_2 = arith.constant 0 : i32
    return %arg0, %c0_i32, %c0_i32_0, %c0_i32_1 : i32, i32, i32, i32
  }
}

</mosaic_0001>

<bundles_post_ra>
// kernel: ca_forward.4
= control target key start
LH: loop header
LB: loop body
LE: loop exit
PB: predicated region body
PF: predicated region fallthrough
CT: control target
= control target key end

     0   :  { %s536_s18 = smov 0   ;;  %s618_s0 = inlined_call_operand.vmem [shape: f32[2,144,16], index: 0, kind: input, shape index: {}]   ;;  %s619_s1 = inlined_call_operand.vmem [shape: f32[8,144], index: 1, kind: input, shape index: {}]   ;;  %s620_s2 = inlined_call_operand.vmem [shape: f32[8,1], index: 2, kind: input, shape index: {}]   ;;  %s621_s3 = inlined_call_operand.vmem [shape: f32[8,1], index: 3, kind: input, shape index: {}]   ;;  %s622_s4 = inlined_call_operand.vmem [shape: f32[16,64], index: 4, kind: input, shape index: {}]   ;;  %s623_s5 = inlined_call_operand.vmem [shape: f32[2,8,64], index: 5, kind: output, shape index: {}]  }
   0x1 LB: > { %s461_s19 = sadd.s32 4294967295, %s501_s18   ;;  %p465_p0 = scmp.ge.s32.totalorder %s501_s18, 1  ;;  %s501_s18 = sphi %s536_s18, %s15_s18  }
   0x2   : > { %p187_p1 = scmp.lt.s32.totalorder %s501_s18, 3 }
   0x4   : > { %p188_p2 = pnand %p465_p0, %p187_p1 }
   0x5   : > { %p214_p3 = scmp.lt.s32.totalorder (!%p188_p2), %s461_s19, 1 }
   0x6   : > { %191 = sbr.rel (%p188_p2) target bundleno = 443 (0x1bb), region = 40 }
   0xb   : > { %v224_v0 = vld [vmem:[%s619_s1 + $0x8] sm:$0xff]  ;;  %vm243_vm0 = vcmask 130048   ;;  %v503_v1 = vmov 0.0   ;;  %v317_v2 = vld [vmem:[%s620_s2] sm:$0xff]  ;;  %s625_s19 = smov (!%p214_p3, %s461_s19), 1  ;;  %v504_v3 = vmov 0  }
   0xc   : > { %247 = vmatprep.subr.mxu0 %v503_v1  ;;  %468 = vmatprep.mubr.msk.f32.mxu0 %vm243_vm0, %v224_v0  ;;  %s482_s24 = smul.u32 144, %s625_s19  ;;  %v324_v4 = vld [vmem:[%s621_s3] sm:$0xff]  ;;  %v332_v24 = vld [vmem:[%s622_s4 + $0x8] sm:$0xff]  ;;  %vm505_vm1 = vmmov 0   ;;  %s467_s11 = sshll.u32 %s625_s19, 3  ;;  %vm406_vm2 = vcmask 523264  }
   0xd   : > { %494 = vset.pattern.permute.xlu0 %v504_v3  ;;  %475 = vmatprep.subr.mxu1 %v503_v1  ;;  %v223_v23 = vld [vmem:[%s619_s1] sm:$0xff]  ;;  %s222_s14 = scalar_lea.vmem %s623_s5, %s467_s11 }
   0xe   : > { %320 = vperm.xlu0 %494, %v317_v2   ;;  %s562_s29 = scalar_lea.vmem %s618_s0, %s482_s24  ;;  %476 = vmatpush3.msra.mxu1 %v332_v24  ;;  %v331_v25 = vld [vmem:[%s622_s4] sm:$0xff] }
   0xf   : > { %v240_v5 = vld [vmem:[%s562_s29 + $0x78] sm:$0xff]  ;;  %v239_v6 = vld [vmem:[%s562_s29 + $0x70] sm:$0xff]  ;;  %v238_v7 = vld [vmem:[%s562_s29 + $0x68] sm:$0xff]  ;;  %477 = vmatprep.subr.mxu1 %v503_v1  ;;  %479 = vmatprep.mubr.msk.f32.mxu1 %vm505_vm1, %v503_v1 }
  0x10   : > { %248 = vmatpush1.msra.mxu0 %v240_v5  ;;  %v237_v8 = vld [vmem:[%s562_s29 + $0x60] sm:$0xff]  ;;  %v236_v9 = vld [vmem:[%s562_s29 + $0x58] sm:$0xff]  ;;  %v235_v10 = vld [vmem:[%s562_s29 + $0x50] sm:$0xff]  ;;  %478 = vmatpush3.msra.mxu1 %v331_v25 }
  0x11   : > { %249 = vmatprep.subr.mxu0 %v503_v1  ;;  %v234_v11 = vld [vmem:[%s562_s29 + $0x48] sm:$0xff]  ;;  %v233_v12 = vld [vmem:[%s562_s29 + $0x40] sm:$0xff]  ;;  %v232_v13 = vld [vmem:[%s562_s29 + $0x38] sm:$0xff] }
  0x12   : > { %327 = vperm.xlu0 %494, %v324_v4   ;;  %250 = vmatpush1.msra.mxu0 %v239_v6  ;;  %v231_v14 = vld [vmem:[%s562_s29 + $0x30] sm:$0xff]  ;;  %v230_v15 = vld [vmem:[%s562_s29 + $0x28] sm:$0xff]  ;;  %v229_v16 = vld [vmem:[%s562_s29 + $0x20] sm:$0xff] }
  0x13   : > { %251 = vmatprep.subr.mxu0 %v503_v1  ;;  %v228_v17 = vld [vmem:[%s562_s29 + $0x18] sm:$0xff]  ;;  %v227_v18 = vld [vmem:[%s562_s29 + $0x10] sm:$0xff]  ;;  %v226_v19 = vld [vmem:[%s562_s29 + $0x8] sm:$0xff] }
  0x14   : > { %252 = vmatpush1.msra.mxu0 %v238_v7  ;;  %v225_v20 = vld [vmem:[%s562_s29] sm:$0xff]  ;;  %v242_v21 = vld [vmem:[%s562_s29 + $0x88] sm:$0xff] }
  0x15   : > { %253 = vmatprep.subr.mxu0 %v503_v1  ;;  %v241_v22 = vld [vmem:[%s562_s29 + $0x80] sm:$0xff] }
  0x16   : > { %254 = vmatpush1.msra.mxu0 %v237_v8 }
  0x17   : > { %255 = vmatprep.subr.mxu0 %v503_v1 }
  0x18   : > { %256 = vmatpush1.msra.mxu0 %v236_v9 }
  0x19   : > { %257 = vmatprep.subr.mxu0 %v503_v1 }
  0x1a   : > { %258 = vmatpush1.msra.mxu0 %v235_v10 }
  0x1b   : > { %259 = vmatprep.subr.mxu0 %v503_v1 }
  0x1c   : > { %260 = vmatpush1.msra.mxu0 %v234_v11 }
  0x1d   : > { %261 = vmatprep.subr.mxu0 %v503_v1 }
  0x1e   : > { %262 = vmatpush1.msra.mxu0 %v233_v12 }
  0x1f   : > { %263 = vmatprep.subr.mxu0 %v503_v1 }
  0x20   : > { %264 = vmatpush1.msra.mxu0 %v232_v13 }
  0x21   : > { %265 = vmatprep.subr.mxu0 %v503_v1 }
  0x22   : > { %266 = vmatpush1.msra.mxu0 %v231_v14 }
  0x23   : > { %267 = vmatprep.subr.mxu0 %v503_v1 }
  0x24   : > { %268 = vmatpush1.msra.mxu0 %v230_v15 }
  0x25   : > { %269 = vmatprep.subr.mxu0 %v503_v1 }
  0x26   : > { %270 = vmatpush1.msra.mxu0 %v229_v16 }
  0x27   : > { %271 = vmatprep.subr.mxu0 %v503_v1 }
  0x28   : > { %272 = vmatpush1.msra.mxu0 %v228_v17 }
  0x29   : > { %273 = vmatprep.subr.mxu0 %v503_v1 }
  0x2a   : > { %274 = vmatpush1.msra.mxu0 %v227_v18 }
  0x2b   : > { %275 = vmatprep.subr.mxu0 %v503_v1 }
  0x2c   : > { %276 = vmatpush1.msra.mxu0 %v226_v19 }
  0x2d   : > { %277 = vmatprep.subr.mxu0 %v503_v1 }
  0x2e   : > { %278 = vmatpush1.msra.mxu0 %v225_v20 }
  0x2f   : > { %307 = vmatprep.subr.mxu0 %v503_v1 }
  0x30   : > { %308 = vmatpush2.msra.mxu0 %v242_v21 }
  0x31   : > { %309 = vmatprep.subr.mxu0 %v503_v1 }
  0x32   : > { %310 = vmatpush2.msra.mxu0 %v241_v22 }
  0x33   : > { %312 = vmatmul.mubr.f32.vlgmr.msra.gmra.mxu0 %v223_v23 }
  0x89   : > { %v321_v26 = vpop.permute.xlu0 %320 }
  0x8d   : > { %v328_v29 = vpop.permute.xlu0 %327 }
  0xf3   : > { %v313_v27 = vpop.f32.mrf.mxu0 }
  0xf4   : > { %v323_v28 = vmul.f32 %v321_v26, %v313_v27 }
  0xf5   : > { %v315_v30 = vpop.f32.mrf.mxu0 }
  0xf6   : > { %v330_v31 = vadd.f32 %v328_v29, %v323_v28 }
  0xf8   : > { %480 = vmatmul.mubr.msk.f32.vlgmr.msra.gmra.mxu1 %vm243_vm0, %v330_v31 }
 0x1b8   : > { %v402_v32 = vpop.f32.mrf.mxu1 }
 0x1b9   : > { %407 = vst.msk [vmem:[%s222_s14] sm:$0xff] %vm406_vm2, %v402_v32 }
 0x1ba   : > { %v481_v33 = vpop.f32.mrf.mxu1 }
 0x1bb PF: > { %s15_s18 = sadd.s32 1, %s501_s18  }
 0x1bc   : > { %p12_p4 = scmp.ge.s32.totalorder %s15_s18, 4  }
 0x1be   :  { %14 = sbr.rel (!%p12_p4) target bundleno = 1 (0x1), region = 70 }

// kernel: ca_forward.5
= control target key start
LH: loop header
LB: loop body
LE: loop exit
PB: predicated region body
PF: predicated region fallthrough
CT: control target
= control target key end

     0   :  { %s572_s18 = smov 0   ;;  %s661_s0 = inlined_call_operand.vmem [shape: f32[2,72,64], index: 0, kind: input, shape index: {}]   ;;  %s662_s1 = inlined_call_operand.vmem [shape: f32[4,72], index: 1, kind: input, shape index: {}]   ;;  %s663_s2 = inlined_call_operand.vmem [shape: f32[4,1], index: 2, kind: input, shape index: {}]   ;;  %s664_s3 = inlined_call_operand.vmem [shape: f32[4,1], index: 3, kind: input, shape index: {}]   ;;  %s665_s4 = inlined_call_operand.vmem [shape: f32[64,256], index: 4, kind: input, shape index: {}]   ;;  %s666_s5 = inlined_call_operand.vmem [shape: f32[2,4,256], index: 5, kind: output, shape index: {}]  }
   0x1 LB: > { %s474_s19 = sadd.s32 4294967295, %s537_s18   ;;  %p478_p0 = scmp.ge.s32.totalorder %s537_s18, 1  ;;  %s537_s18 = sphi %s572_s18, %s15_s18  }
   0x2   : > { %p187_p1 = scmp.lt.s32.totalorder %s537_s18, 3 }
   0x4   : > { %p188_p2 = pnand %p478_p0, %p187_p1 }
   0x5   : > { %p215_p3 = scmp.lt.s32.totalorder (!%p188_p2), %s474_s19, 1 }
   0x6   : > { %191 = sbr.rel (%p188_p2) target bundleno = 429 (0x1ad), region = 40 }
   0xb   : > { %v539_v0 = vmov 0.0   ;;  %vm540_vm0 = vmmov 0   ;;  %v309_v1 = vld [vmem:[%s663_s2] sm:$0xf]  ;;  %v338_v2 = vld [vmem:[%s665_s4 + $0x78] sm:$0xff]  ;;  %s668_s19 = smov (!%p215_p3, %s474_s19), 1 }
   0xc   : > { %497 = vmatprep.subr.mxu0 %v539_v0  ;;  %515 = vmatprep.mubr.msk.f32.mxu0 %vm540_vm0, %v539_v0  ;;  %v541_v3 = vmov 0   ;;  %v337_v4 = vld [vmem:[%s665_s4 + $0x70] sm:$0xff]  ;;  %v336_v5 = vld [vmem:[%s665_s4 + $0x68] sm:$0xff]  ;;  %v335_v6 = vld [vmem:[%s665_s4 + $0x60] sm:$0xff]  ;;  %s518_s7 = smul.u32 72, %s668_s19  ;;  %vm235_vm1 = vcmask 588800  }
   0xd   : > { %530 = vset.pattern.permute.xlu0 %v541_v3  ;;  %359 = vmatprep.subr.mxu1 %v338_v2  ;;  %v334_v7 = vld [vmem:[%s665_s4 + $0x58] sm:$0xff]  ;;  %v316_v8 = vld [vmem:[%s664_s3] sm:$0xf]  ;;  %v333_v9 = vld [vmem:[%s665_s4 + $0x50] sm:$0xff]  ;;  %vm339_vm2 = vcmask 523264   ;;  %s486_s14 = sshll.u32 %s668_s19, 3 }
   0xe   : > { %312 = vperm.xlu0 %530, %v309_v1   ;;  %360 = vmatpush1.msra.mxu1 %v337_v4  ;;  %v332_v10 = vld [vmem:[%s665_s4 + $0x48] sm:$0xff]  ;;  %s613_s16 = scalar_lea.vmem %s661_s0, %s518_s7  ;;  %v331_v11 = vld [vmem:[%s665_s4 + $0x40] sm:$0xff]  ;;  %v330_v14 = vld [vmem:[%s665_s4 + $0x38] sm:$0xff]  ;;  %s224_s17 = scalar_lea.vmem %s666_s5, %s486_s14 }
   0xf   : > { %361 = vmatprep.subr.mxu1 %v336_v5  ;;  %407 = vmatprep.mubr.f32.mxu1 %v539_v0  ;;  %v234_v12 = vld [vmem:[%s613_s16 + $0x40] sm:$0xff]  ;;  %v233_v13 = vld [vmem:[%s613_s16 + $0x38] sm:$0xff]  ;;  %v329_v15 = vld [vmem:[%s665_s4 + $0x30] sm:$0xff] }
  0x10   : > { %362 = vmatpush1.msra.mxu1 %v335_v6  ;;  %498 = vmatpush3.msra.mxu0 %v234_v12  ;;  %v232_v16 = vld [vmem:[%s613_s16 + $0x30] sm:$0xff]  ;;  %v328_v17 = vld [vmem:[%s665_s4 + $0x28] sm:$0xff]  ;;  %v230_v19 = vld [vmem:[%s613_s16 + $0x20] sm:$0xff] }
  0x11   : > { %363 = vmatprep.subr.mxu1 %v334_v7  ;;  %499 = vmatprep.subr.mxu0 %v539_v0  ;;  %v231_v18 = vld [vmem:[%s613_s16 + $0x28] sm:$0xff]  ;;  %v229_v20 = vld [vmem:[%s613_s16 + $0x18] sm:$0xff]  ;;  %v228_v21 = vld [vmem:[%s613_s16 + $0x10] sm:$0xff] }
  0x12   : > { %319 = vperm.xlu0 %530, %v316_v8   ;;  %364 = vmatpush1.msra.mxu1 %v333_v9  ;;  %v227_v22 = vld [vmem:[%s613_s16 + $0x8] sm:$0xff]  ;;  %v226_v23 = vld [vmem:[%s613_s16] sm:$0xff]  ;;  %v326_v26 = vld [vmem:[%s665_s4 + $0x18] sm:$0xff] }
  0x13   : > { %365 = vmatprep.subr.mxu1 %v332_v10  ;;  %500 = vmatpush3.msra.mxu0 %v233_v13  ;;  %v225_v24 = vld [vmem:[%s662_s1] sm:$0xf]  ;;  %v325_v27 = vld [vmem:[%s665_s4 + $0x10] sm:$0xff]  ;;  %v324_v28 = vld [vmem:[%s665_s4 + $0x8] sm:$0xff] }
  0x14   : > { %366 = vmatpush1.msra.mxu1 %v331_v11  ;;  %501 = vmatprep.subr.mxu0 %v539_v0  ;;  %v327_v25 = vld [vmem:[%s665_s4 + $0x20] sm:$0xff] }
  0x15   : > { %367 = vmatprep.subr.mxu1 %v330_v14  ;;  %502 = vmatpush3.msra.mxu0 %v232_v16  ;;  %v323_v29 = vld [vmem:[%s665_s4] sm:$0xff] }
  0x16   : > { %368 = vmatpush1.msra.mxu1 %v329_v15  ;;  %503 = vmatprep.subr.mxu0 %v539_v0 }
  0x17   : > { %369 = vmatprep.subr.mxu1 %v328_v17  ;;  %504 = vmatpush3.msra.mxu0 %v231_v18 }
  0x18   : > { %505 = vmatprep.subr.mxu0 %v539_v0  ;;  %370 = vmatpush1.msra.mxu1 %v327_v25 }
  0x19   : > { %506 = vmatpush3.msra.mxu0 %v230_v19  ;;  %371 = vmatprep.subr.mxu1 %v326_v26 }
  0x1a   : > { %507 = vmatprep.subr.mxu0 %v539_v0  ;;  %372 = vmatpush1.msra.mxu1 %v325_v27 }
  0x1b   : > { %508 = vmatpush3.msra.mxu0 %v229_v20  ;;  %373 = vmatprep.subr.mxu1 %v324_v28 }
  0x1c   : > { %509 = vmatprep.subr.mxu0 %v539_v0  ;;  %374 = vmatpush1.msra.mxu1 %v323_v29 }
  0x1d   : > { %510 = vmatpush3.msra.mxu0 %v228_v21 }
  0x1e   : > { %511 = vmatprep.subr.mxu0 %v539_v0 }
  0x1f   : > { %512 = vmatpush3.msra.mxu0 %v227_v22 }
  0x20   : > { %513 = vmatprep.subr.mxu0 %v539_v0 }
  0x21   : > { %514 = vmatpush3.msra.mxu0 %v226_v23 }
  0x22   : > { %516 = vmatmul.mubr.msk.f32.vlgmr.msra.gmra.mxu0 %vm235_vm1, %v225_v24 }
  0x89   : > { %v313_v30 = vpop.permute.xlu0 %312 }
  0x8d   : > { %v320_v33 = vpop.permute.xlu0 %319 }
  0xe2   : > { %v305_v31 = vpop.f32.mrf.mxu0 }
  0xe3   : > { %v315_v32 = vmul.f32 %v313_v30, %v305_v31 }
  0xe4   : > { %v517_v34 = vpop.f32.mrf.mxu0 }
  0xe5   : > { %v322_v35 = vadd.f32 %v320_v33, %v315_v32 }
  0xe7   : > { %483 = vmatmul.mubr.msk.f32.vlgmr.msra.gmra.mxu1 %vm339_vm2, %v322_v35 }
 0x1a7   : > { %v409_v36 = vpop.f32.mrf.mxu1 }
 0x1a9   : > { %v411_v37 = vpop.f32.mrf.mxu1 }
 0x1aa   : > { %v416_v38 = vcombine.low %v409_v36, %v411_v37 }
 0x1ac   : > { %418 = vst [vmem:[%s224_s17] sm:$0xff] %v416_v38 }
 0x1ad PF: > { %s15_s18 = sadd.s32 1, %s537_s18  }
 0x1ae   : > { %p12_p4 = scmp.ge.s32.totalorder %s15_s18, 4  }
 0x1b0   :  { %14 = sbr.rel (!%p12_p4) target bundleno = 1 (0x1), region = 70 }

// kernel: ca_forward.6
= control target key start
LH: loop header
LB: loop body
LE: loop exit
PB: predicated region body
PF: predicated region fallthrough
CT: control target
= control target key end

     0   :  { %s1043_s18 = smov 0   ;;  %s1859_s0 = inlined_call_operand.vmem [shape: f32[2,36,256], index: 0, kind: input, shape index: {}]   ;;  %s1860_s1 = inlined_call_operand.vmem [shape: f32[2,36], index: 1, kind: input, shape index: {}]   ;;  %s1861_s2 = inlined_call_operand.vmem [shape: f32[2,1], index: 2, kind: input, shape index: {}]   ;;  %s1862_s3 = inlined_call_operand.vmem [shape: f32[2,1], index: 3, kind: input, shape index: {}]   ;;  %s1863_s4 = inlined_call_operand.vmem [shape: f32[256,1024], index: 4, kind: input, shape index: {}]   ;;  %s1864_s5 = inlined_call_operand.vmem [shape: f32[2,2,1024], index: 5, kind: output, shape index: {}]  }
   0x1 LB: > { %s975_s19 = sadd.s32 4294967295, %s1008_s18   ;;  %p979_p0 = scmp.ge.s32.totalorder %s1008_s18, 1  ;;  %s1008_s18 = sphi %s1043_s18, %s15_s18  }
   0x2   : > { %p187_p1 = scmp.lt.s32.totalorder %s1008_s18, 3 }
   0x4   : > { %p188_p2 = pnand %p979_p0, %p187_p1 }
   0x5   : > { %p215_p3 = scmp.lt.s32.totalorder (!%p188_p2), %s975_s19, 1 }
   0x6   : > { %191 = sbr.rel (%p188_p2) target bundleno = 494 (0x1ee), region = 40 }
   0xb   : > { %v1010_v0 = vmov 0.0   ;;  %v318_v1 = vld [vmem:[%s1861_s2] sm:$0x3]  ;;  %v455_v2 = vld [vmem:[%s1863_s4 + $0x3c8] sm:$0xff]  ;;  %s1866_s19 = smov (!%p215_p3, %s975_s19), 1  ;;  %v1011_v3 = vmov 0  }
   0xc   : > { %311 = vmatprep.mubr.f32.mxu0 %v1010_v0  ;;  %1001 = vset.pattern.permute.xlu0 %v1011_v3  ;;  %v454_v4 = vld [vmem:[%s1863_s4 + $0x3c0] sm:$0xff]  ;;  %v447_v5 = vld [vmem:[%s1863_s4 + $0x388] sm:$0xff]  ;;  %s989_s30 = smul.u32 80, %s1866_s19  ;;  %vm240_vm0 = vcmask 1043456   ;;  %vm236_vm1 = vcmask 293888   ;;  %v457_v30 = vld [vmem:[%s1863_s4 + $0x3d8] sm:$0xff] }
   0xd   : > { %590 = vmatprep.subr.mxu1 %v455_v2  ;;  %321 = vperm.xlu0 %1001, %v318_v1   ;;  %v446_v6 = vld [vmem:[%s1863_s4 + $0x380] sm:$0xff]  ;;  %v439_v8 = vld [vmem:[%s1863_s4 + $0x348] sm:$0xff]  ;;  %v456_v31 = vld [vmem:[%s1863_s4 + $0x3d0] sm:$0xff]  ;;  %s988_s11 = sshll.u32 %s1866_s19, 4 }
   0xe   : > { %591 = vmatpush1.msra.mxu1 %v454_v4  ;;  %v326_v7 = vld [vmem:[%s1862_s3] sm:$0x3]  ;;  %v431_v10 = vld [vmem:[%s1863_s4 + $0x308] sm:$0xff]  ;;  %s1084_s16 = scalar_lea.vmem %s1859_s0, %s989_s30  ;;  %v449_v33 = vld [vmem:[%s1863_s4 + $0x398] sm:$0xff]  ;;  %s224_s14 = scalar_lea.vmem %s1864_s5, %s988_s11 }
   0xf   : > { %592 = vmatprep.subr.mxu1 %v447_v5  ;;  %v438_v9 = vld [vmem:[%s1863_s4 + $0x340] sm:$0xff]  ;;  %v235_v12 = vld [vmem:[%s1084_s16 + $0x48] sm:$0xf]  ;;  %v233_v14 = vld [vmem:[%s1084_s16 + $0x38] sm:$0xff] }
  0x10   : > { %593 = vmatpush1.msra.mxu1 %v446_v6  ;;  %v430_v11 = vld [vmem:[%s1863_s4 + $0x300] sm:$0xff]  ;;  %983 = vmatprep.subr.msk.mxu0 %vm240_vm0, %v235_v12  ;;  %v232_v15 = vld [vmem:[%s1084_s16 + $0x30] sm:$0xff]  ;;  %v231_v16 = vld [vmem:[%s1084_s16 + $0x28] sm:$0xff] }
  0x11   : > { %594 = vmatprep.subr.mxu1 %v439_v8  ;;  %v234_v13 = vld [vmem:[%s1084_s16 + $0x40] sm:$0xf]  ;;  %329 = vperm.xlu0 %1001, %v326_v7   ;;  %v423_v18 = vld [vmem:[%s1863_s4 + $0x2c8] sm:$0xff]  ;;  %v229_v19 = vld [vmem:[%s1084_s16 + $0x18] sm:$0xff] }
  0x12   : > { %595 = vmatpush1.msra.mxu1 %v438_v9  ;;  %984 = vmatpush1.msk.msra.mxu0 %vm240_vm0, %v234_v13  ;;  %v230_v17 = vld [vmem:[%s1084_s16 + $0x20] sm:$0xff]  ;;  %v415_v21 = vld [vmem:[%s1863_s4 + $0x288] sm:$0xff]  ;;  %v228_v22 = vld [vmem:[%s1084_s16 + $0x10] sm:$0xff] }
  0x13   : > { %596 = vmatprep.subr.mxu1 %v431_v10  ;;  %271 = vmatprep.subr.mxu0 %v233_v14  ;;  %v422_v20 = vld [vmem:[%s1863_s4 + $0x2c0] sm:$0xff]  ;;  %v227_v24 = vld [vmem:[%s1084_s16 + $0x8] sm:$0xff]  ;;  %v448_v35 = vld [vmem:[%s1863_s4 + $0x390] sm:$0xff] }
  0x14   : > { %597 = vmatpush1.msra.mxu1 %v430_v11  ;;  %272 = vmatpush1.msra.mxu0 %v232_v15  ;;  %v414_v23 = vld [vmem:[%s1863_s4 + $0x280] sm:$0xff]  ;;  %v407_v25 = vld [vmem:[%s1863_s4 + $0x248] sm:$0xff]  ;;  %v441_v37 = vld [vmem:[%s1863_s4 + $0x358] sm:$0xff] }
  0x15   : > { %598 = vmatprep.subr.mxu1 %v423_v18  ;;  %273 = vmatprep.subr.mxu0 %v231_v16  ;;  %v406_v26 = vld [vmem:[%s1863_s4 + $0x240] sm:$0xff]  ;;  %v399_v28 = vld [vmem:[%s1863_s4 + $0x208] sm:$0xff]  ;;  %v440_v39 = vld [vmem:[%s1863_s4 + $0x350] sm:$0xff] }
  0x16   : > { %599 = vmatpush1.msra.mxu1 %v422_v20  ;;  %274 = vmatpush1.msra.mxu0 %v230_v17  ;;  %v226_v27 = vld [vmem:[%s1084_s16] sm:$0xff]  ;;  %v391_v34 = vld [vmem:[%s1863_s4 + $0x1c8] sm:$0xff]  ;;  %v433_v41 = vld [vmem:[%s1863_s4 + $0x318] sm:$0xff] }
  0x17   : > { %600 = vmatprep.subr.mxu1 %v415_v21  ;;  %275 = vmatprep.subr.mxu0 %v229_v19  ;;  %v225_v29 = vld [vmem:[%s1860_s1] sm:$0x3]  ;;  %v383_v38 = vld [vmem:[%s1863_s4 + $0x188] sm:$0xff]  ;;  %v432_v43 = vld [vmem:[%s1863_s4 + $0x310] sm:$0xff] }
  0x18   : > { %601 = vmatpush1.msra.mxu1 %v414_v23  ;;  %276 = vmatpush1.msra.mxu0 %v228_v22  ;;  %v398_v32 = vld [vmem:[%s1863_s4 + $0x200] sm:$0xff]  ;;  %v375_v42 = vld [vmem:[%s1863_s4 + $0x148] sm:$0xff]  ;;  %v425_v45 = vld [vmem:[%s1863_s4 + $0x2d8] sm:$0xff] }
  0x19   : > { %602 = vmatprep.subr.mxu1 %v407_v25  ;;  %277 = vmatprep.subr.mxu0 %v227_v24  ;;  %v390_v36 = vld [vmem:[%s1863_s4 + $0x1c0] sm:$0xff]  ;;  %v367_v46 = vld [vmem:[%s1863_s4 + $0x108] sm:$0xff]  ;;  %v424_v47 = vld [vmem:[%s1863_s4 + $0x2d0] sm:$0xff] }
  0x1a   : > { %603 = vmatpush1.msra.mxu1 %v406_v26  ;;  %278 = vmatpush1.msra.mxu0 %v226_v27  ;;  %v382_v40 = vld [vmem:[%s1863_s4 + $0x180] sm:$0xff]  ;;  %v417_v49 = vld [vmem:[%s1863_s4 + $0x298] sm:$0xff]  ;;  %v359_v50 = vld [vmem:[%s1863_s4 + $0xc8] sm:$0xff] }
  0x1b   : > { %604 = vmatprep.subr.mxu1 %v399_v28  ;;  %985 = vmatmul.mubr.msk.f32.vlgmr.msra.gmra.mxu0 %vm236_vm1, %v225_v29  ;;  %v374_v44 = vld [vmem:[%s1863_s4 + $0x140] sm:$0xff]  ;;  %v416_v51 = vld [vmem:[%s1863_s4 + $0x290] sm:$0xff]  ;;  %v409_v53 = vld [vmem:[%s1863_s4 + $0x258] sm:$0xff] }
  0x1c   : > { %661 = vmatprep.subr.mxu0 %v457_v30  ;;  %605 = vmatpush1.msra.mxu1 %v398_v32  ;;  %v366_v48 = vld [vmem:[%s1863_s4 + $0x100] sm:$0xff]  ;;  %v351_v54 = vld [vmem:[%s1863_s4 + $0x88] sm:$0xff]  ;;  %v408_v55 = vld [vmem:[%s1863_s4 + $0x250] sm:$0xff] }
  0x1d   : > { %662 = vmatpush1.msra.mxu0 %v456_v31  ;;  %606 = vmatprep.subr.mxu1 %v391_v34  ;;  %v358_v52 = vld [vmem:[%s1863_s4 + $0xc0] sm:$0xff]  ;;  %v401_v57 = vld [vmem:[%s1863_s4 + $0x218] sm:$0xff]  ;;  %v343_v58 = vld [vmem:[%s1863_s4 + $0x48] sm:$0xff] }
  0x1e   : > { %663 = vmatprep.subr.mxu0 %v449_v33  ;;  %607 = vmatpush1.msra.mxu1 %v390_v36  ;;  %v350_v56 = vld [vmem:[%s1863_s4 + $0x80] sm:$0xff]  ;;  %v400_v59 = vld [vmem:[%s1863_s4 + $0x210] sm:$0xff]  ;;  %v393_v61 = vld [vmem:[%s1863_s4 + $0x1d8] sm:$0xff] }
  0x1f   : > { %664 = vmatpush1.msra.mxu0 %v448_v35  ;;  %608 = vmatprep.subr.mxu1 %v383_v38  ;;  %v342_v60 = vld [vmem:[%s1863_s4 + $0x40] sm:$0xff]  ;;  %v335_v62 = vld [vmem:[%s1863_s4 + $0x8] sm:$0xff]  ;;  %v392_v63 = vld [vmem:[%s1863_s4 + $0x1d0] sm:$0xff] }
  0x20   : > { %665 = vmatprep.subr.mxu0 %v441_v37  ;;  %609 = vmatpush1.msra.mxu1 %v382_v40  ;;  %v334_v0 = vld [vmem:[%s1863_s4] sm:$0xff]  ;;  %v385_v1 = vld [vmem:[%s1863_s4 + $0x198] sm:$0xff]  ;;  %v583_v2 = vld [vmem:[%s1863_s4 + $0x7c8] sm:$0xff] }
  0x21   : > { %666 = vmatpush1.msra.mxu0 %v440_v39  ;;  %610 = vmatprep.subr.mxu1 %v375_v42  ;;  %v384_v3 = vld [vmem:[%s1863_s4 + $0x190] sm:$0xff]  ;;  %v582_v4 = vld [vmem:[%s1863_s4 + $0x7c0] sm:$0xff]  ;;  %v377_v5 = vld [vmem:[%s1863_s4 + $0x158] sm:$0xff] }
  0x22   : > { %667 = vmatprep.subr.mxu0 %v433_v41  ;;  %611 = vmatpush1.msra.mxu1 %v374_v44  ;;  %v575_v6 = vld [vmem:[%s1863_s4 + $0x788] sm:$0xff]  ;;  %v376_v7 = vld [vmem:[%s1863_s4 + $0x150] sm:$0xff]  ;;  %v574_v8 = vld [vmem:[%s1863_s4 + $0x780] sm:$0xff] }
  0x23   : > { %668 = vmatpush1.msra.mxu0 %v432_v43  ;;  %612 = vmatprep.subr.mxu1 %v367_v46  ;;  %v369_v9 = vld [vmem:[%s1863_s4 + $0x118] sm:$0xff]  ;;  %v567_v10 = vld [vmem:[%s1863_s4 + $0x748] sm:$0xff]  ;;  %v368_v11 = vld [vmem:[%s1863_s4 + $0x110] sm:$0xff] }
  0x24   : > { %669 = vmatprep.subr.mxu0 %v425_v45  ;;  %613 = vmatpush1.msra.mxu1 %v366_v48  ;;  %v566_v12 = vld [vmem:[%s1863_s4 + $0x740] sm:$0xff]  ;;  %v361_v13 = vld [vmem:[%s1863_s4 + $0xd8] sm:$0xff]  ;;  %v559_v14 = vld [vmem:[%s1863_s4 + $0x708] sm:$0xff] }
  0x25   : > { %670 = vmatpush1.msra.mxu0 %v424_v47  ;;  %614 = vmatprep.subr.mxu1 %v359_v50  ;;  %v360_v15 = vld [vmem:[%s1863_s4 + $0xd0] sm:$0xff]  ;;  %v558_v16 = vld [vmem:[%s1863_s4 + $0x700] sm:$0xff]  ;;  %v353_v17 = vld [vmem:[%s1863_s4 + $0x98] sm:$0xff] }
  0x26   : > { %671 = vmatprep.subr.mxu0 %v417_v49  ;;  %615 = vmatpush1.msra.mxu1 %v358_v52  ;;  %v551_v18 = vld [vmem:[%s1863_s4 + $0x6c8] sm:$0xff]  ;;  %v352_v19 = vld [vmem:[%s1863_s4 + $0x90] sm:$0xff]  ;;  %v550_v20 = vld [vmem:[%s1863_s4 + $0x6c0] sm:$0xff] }
  0x27   : > { %672 = vmatpush1.msra.mxu0 %v416_v51  ;;  %616 = vmatprep.subr.mxu1 %v351_v54  ;;  %v345_v21 = vld [vmem:[%s1863_s4 + $0x58] sm:$0xff]  ;;  %v543_v22 = vld [vmem:[%s1863_s4 + $0x688] sm:$0xff]  ;;  %v344_v23 = vld [vmem:[%s1863_s4 + $0x50] sm:$0xff] }
  0x28   : > { %673 = vmatprep.subr.mxu0 %v409_v53  ;;  %617 = vmatpush1.msra.mxu1 %v350_v56  ;;  %v542_v24 = vld [vmem:[%s1863_s4 + $0x680] sm:$0xff]  ;;  %v337_v25 = vld [vmem:[%s1863_s4 + $0x18] sm:$0xff]  ;;  %v535_v26 = vld [vmem:[%s1863_s4 + $0x648] sm:$0xff] }
  0x29   : > { %674 = vmatpush1.msra.mxu0 %v408_v55  ;;  %618 = vmatprep.subr.mxu1 %v343_v58  ;;  %v336_v27 = vld [vmem:[%s1863_s4 + $0x10] sm:$0xff]  ;;  %v534_v28 = vld [vmem:[%s1863_s4 + $0x640] sm:$0xff]  ;;  %v585_v29 = vld [vmem:[%s1863_s4 + $0x7d8] sm:$0xff] }
  0x2a   : > { %675 = vmatprep.subr.mxu0 %v401_v57  ;;  %619 = vmatpush1.msra.mxu1 %v342_v60  ;;  %v527_v30 = vld [vmem:[%s1863_s4 + $0x608] sm:$0xff]  ;;  %v584_v31 = vld [vmem:[%s1863_s4 + $0x7d0] sm:$0xff]  ;;  %v526_v32 = vld [vmem:[%s1863_s4 + $0x600] sm:$0xff] }
  0x2b   : > { %676 = vmatpush1.msra.mxu0 %v400_v59  ;;  %620 = vmatprep.subr.mxu1 %v335_v62  ;;  %v577_v33 = vld [vmem:[%s1863_s4 + $0x798] sm:$0xff]  ;;  %v519_v34 = vld [vmem:[%s1863_s4 + $0x5c8] sm:$0xff]  ;;  %v576_v35 = vld [vmem:[%s1863_s4 + $0x790] sm:$0xff] }
  0x2c   : > { %677 = vmatprep.subr.mxu0 %v393_v61  ;;  %621 = vmatpush1.msra.mxu1 %v334_v0  ;;  %v518_v36 = vld [vmem:[%s1863_s4 + $0x5c0] sm:$0xff]  ;;  %v569_v37 = vld [vmem:[%s1863_s4 + $0x758] sm:$0xff]  ;;  %v511_v38 = vld [vmem:[%s1863_s4 + $0x588] sm:$0xff] }
  0x2d   : > { %678 = vmatpush1.msra.mxu0 %v392_v63  ;;  %622 = vmatprep.subr.mxu1 %v583_v2  ;;  %v568_v39 = vld [vmem:[%s1863_s4 + $0x750] sm:$0xff]  ;;  %v510_v40 = vld [vmem:[%s1863_s4 + $0x580] sm:$0xff]  ;;  %v561_v41 = vld [vmem:[%s1863_s4 + $0x718] sm:$0xff] }
  0x2e   : > { %679 = vmatprep.subr.mxu0 %v385_v1  ;;  %623 = vmatpush2.msra.mxu1 %v582_v4  ;;  %v503_v42 = vld [vmem:[%s1863_s4 + $0x548] sm:$0xff]  ;;  %v560_v43 = vld [vmem:[%s1863_s4 + $0x710] sm:$0xff]  ;;  %v502_v44 = vld [vmem:[%s1863_s4 + $0x540] sm:$0xff] }
  0x2f   : > { %680 = vmatpush1.msra.mxu0 %v384_v3  ;;  %624 = vmatprep.subr.mxu1 %v575_v6  ;;  %v553_v45 = vld [vmem:[%s1863_s4 + $0x6d8] sm:$0xff]  ;;  %v495_v46 = vld [vmem:[%s1863_s4 + $0x508] sm:$0xff]  ;;  %v552_v47 = vld [vmem:[%s1863_s4 + $0x6d0] sm:$0xff] }
  0x30   : > { %681 = vmatprep.subr.mxu0 %v377_v5  ;;  %625 = vmatpush2.msra.mxu1 %v574_v8  ;;  %v494_v48 = vld [vmem:[%s1863_s4 + $0x500] sm:$0xff]  ;;  %v545_v49 = vld [vmem:[%s1863_s4 + $0x698] sm:$0xff]  ;;  %v487_v50 = vld [vmem:[%s1863_s4 + $0x4c8] sm:$0xff] }
  0x31   : > { %682 = vmatpush1.msra.mxu0 %v376_v7  ;;  %626 = vmatprep.subr.mxu1 %v567_v10  ;;  %v544_v51 = vld [vmem:[%s1863_s4 + $0x690] sm:$0xff]  ;;  %v486_v52 = vld [vmem:[%s1863_s4 + $0x4c0] sm:$0xff]  ;;  %v537_v53 = vld [vmem:[%s1863_s4 + $0x658] sm:$0xff] }
  0x32   : > { %683 = vmatprep.subr.mxu0 %v369_v9  ;;  %627 = vmatpush2.msra.mxu1 %v566_v12  ;;  %v536_v54 = vld [vmem:[%s1863_s4 + $0x650] sm:$0xff]  ;;  %v529_v55 = vld [vmem:[%s1863_s4 + $0x618] sm:$0xff]  ;;  %v479_v3 = vld [vmem:[%s1863_s4 + $0x488] sm:$0xff] }
  0x33   : > { %684 = vmatpush1.msra.mxu0 %v368_v11  ;;  %628 = vmatprep.subr.mxu1 %v559_v14  ;;  %v528_v56 = vld [vmem:[%s1863_s4 + $0x610] sm:$0xff]  ;;  %v521_v57 = vld [vmem:[%s1863_s4 + $0x5d8] sm:$0xff]  ;;  %v478_v5 = vld [vmem:[%s1863_s4 + $0x480] sm:$0xff] }
  0x34   : > { %685 = vmatprep.subr.mxu0 %v361_v13  ;;  %629 = vmatpush2.msra.mxu1 %v558_v16  ;;  %v520_v58 = vld [vmem:[%s1863_s4 + $0x5d0] sm:$0xff]  ;;  %v513_v59 = vld [vmem:[%s1863_s4 + $0x598] sm:$0xff]  ;;  %v471_v7 = vld [vmem:[%s1863_s4 + $0x448] sm:$0xff] }
  0x35   : > { %686 = vmatpush1.msra.mxu0 %v360_v15  ;;  %630 = vmatprep.subr.mxu1 %v551_v18  ;;  %v512_v60 = vld [vmem:[%s1863_s4 + $0x590] sm:$0xff]  ;;  %v505_v61 = vld [vmem:[%s1863_s4 + $0x558] sm:$0xff]  ;;  %v470_v9 = vld [vmem:[%s1863_s4 + $0x440] sm:$0xff] }
  0x36   : > { %687 = vmatprep.subr.mxu0 %v353_v17  ;;  %631 = vmatpush2.msra.mxu1 %v550_v20  ;;  %v504_v62 = vld [vmem:[%s1863_s4 + $0x550] sm:$0xff]  ;;  %v497_v63 = vld [vmem:[%s1863_s4 + $0x518] sm:$0xff]  ;;  %v463_v11 = vld [vmem:[%s1863_s4 + $0x408] sm:$0xff] }
  0x37   : > { %688 = vmatpush1.msra.mxu0 %v352_v19  ;;  %632 = vmatprep.subr.mxu1 %v543_v22  ;;  %v496_v0 = vld [vmem:[%s1863_s4 + $0x510] sm:$0xff]  ;;  %v489_v1 = vld [vmem:[%s1863_s4 + $0x4d8] sm:$0xff]  ;;  %v462_v13 = vld [vmem:[%s1863_s4 + $0x400] sm:$0xff] }
  0x38   : > { %689 = vmatprep.subr.mxu0 %v345_v21  ;;  %633 = vmatpush2.msra.mxu1 %v542_v24  ;;  %v488_v2 = vld [vmem:[%s1863_s4 + $0x4d0] sm:$0xff]  ;;  %v481_v4 = vld [vmem:[%s1863_s4 + $0x498] sm:$0xff]  ;;  %v459_v15 = vld [vmem:[%s1863_s4 + $0x3e8] sm:$0xff] }
  0x39   : > { %690 = vmatpush1.msra.mxu0 %v344_v23  ;;  %634 = vmatprep.subr.mxu1 %v535_v26  ;;  %v480_v6 = vld [vmem:[%s1863_s4 + $0x490] sm:$0xff]  ;;  %v473_v8 = vld [vmem:[%s1863_s4 + $0x458] sm:$0xff] }
  0x3a   : > { %691 = vmatprep.subr.mxu0 %v337_v25  ;;  %635 = vmatpush2.msra.mxu1 %v534_v28  ;;  %v472_v10 = vld [vmem:[%s1863_s4 + $0x450] sm:$0xff]  ;;  %v465_v12 = vld [vmem:[%s1863_s4 + $0x418] sm:$0xff]  ;;  %v458_v25 = vld [vmem:[%s1863_s4 + $0x3e0] sm:$0xff] }
  0x3b   : > { %692 = vmatpush1.msra.mxu0 %v336_v27  ;;  %636 = vmatprep.subr.mxu1 %v527_v30  ;;  %v464_v14 = vld [vmem:[%s1863_s4 + $0x410] sm:$0xff]  ;;  %v461_v16 = vld [vmem:[%s1863_s4 + $0x3f8] sm:$0xff]  ;;  %v451_v27 = vld [vmem:[%s1863_s4 + $0x3a8] sm:$0xff] }
  0x3c   : > { %693 = vmatprep.subr.mxu0 %v585_v29  ;;  %637 = vmatpush2.msra.mxu1 %v526_v32  ;;  %v460_v26 = vld [vmem:[%s1863_s4 + $0x3f0] sm:$0xff]  ;;  %v453_v28 = vld [vmem:[%s1863_s4 + $0x3b8] sm:$0xff]  ;;  %v450_v29 = vld [vmem:[%s1863_s4 + $0x3a0] sm:$0xff] }
  0x3d   : > { %694 = vmatpush2.msra.mxu0 %v584_v31  ;;  %638 = vmatprep.subr.mxu1 %v519_v34  ;;  %v452_v30 = vld [vmem:[%s1863_s4 + $0x3b0] sm:$0xff]  ;;  %v443_v31 = vld [vmem:[%s1863_s4 + $0x368] sm:$0xff]  ;;  %v445_v32 = vld [vmem:[%s1863_s4 + $0x378] sm:$0xff] }
  0x3e   : > { %695 = vmatprep.subr.mxu0 %v577_v33  ;;  %639 = vmatpush2.msra.mxu1 %v518_v36  ;;  %v442_v33 = vld [vmem:[%s1863_s4 + $0x360] sm:$0xff]  ;;  %v444_v34 = vld [vmem:[%s1863_s4 + $0x370] sm:$0xff]  ;;  %v437_v36 = vld [vmem:[%s1863_s4 + $0x338] sm:$0xff] }
  0x3f   : > { %696 = vmatpush2.msra.mxu0 %v576_v35  ;;  %640 = vmatprep.subr.mxu1 %v511_v38  ;;  %v435_v35 = vld [vmem:[%s1863_s4 + $0x328] sm:$0xff]  ;;  %v436_v38 = vld [vmem:[%s1863_s4 + $0x330] sm:$0xff] }
  0x40   : > { %697 = vmatprep.subr.mxu0 %v569_v37  ;;  %641 = vmatpush2.msra.mxu1 %v510_v40  ;;  %v434_v37 = vld [vmem:[%s1863_s4 + $0x320] sm:$0xff]  ;;  %v429_v40 = vld [vmem:[%s1863_s4 + $0x2f8] sm:$0xff] }
  0x41   : > { %698 = vmatpush2.msra.mxu0 %v568_v39  ;;  %642 = vmatprep.subr.mxu1 %v503_v42  ;;  %v427_v39 = vld [vmem:[%s1863_s4 + $0x2e8] sm:$0xff]  ;;  %v428_v42 = vld [vmem:[%s1863_s4 + $0x2f0] sm:$0xff] }
  0x42   : > { %699 = vmatprep.subr.mxu0 %v561_v41  ;;  %643 = vmatpush2.msra.mxu1 %v502_v44  ;;  %v426_v41 = vld [vmem:[%s1863_s4 + $0x2e0] sm:$0xff]  ;;  %v421_v44 = vld [vmem:[%s1863_s4 + $0x2b8] sm:$0xff] }
  0x43   : > { %700 = vmatpush2.msra.mxu0 %v560_v43  ;;  %644 = vmatprep.subr.mxu1 %v495_v46  ;;  %v419_v43 = vld [vmem:[%s1863_s4 + $0x2a8] sm:$0xff]  ;;  %v420_v46 = vld [vmem:[%s1863_s4 + $0x2b0] sm:$0xff] }
  0x44   : > { %701 = vmatprep.subr.mxu0 %v553_v45  ;;  %645 = vmatpush2.msra.mxu1 %v494_v48  ;;  %v418_v45 = vld [vmem:[%s1863_s4 + $0x2a0] sm:$0xff]  ;;  %v413_v48 = vld [vmem:[%s1863_s4 + $0x278] sm:$0xff] }
  0x45   : > { %702 = vmatpush2.msra.mxu0 %v552_v47  ;;  %646 = vmatprep.subr.mxu1 %v487_v50  ;;  %v411_v47 = vld [vmem:[%s1863_s4 + $0x268] sm:$0xff]  ;;  %v412_v50 = vld [vmem:[%s1863_s4 + $0x270] sm:$0xff] }
  0x46   : > { %703 = vmatprep.subr.mxu0 %v545_v49  ;;  %647 = vmatpush2.msra.mxu1 %v486_v52  ;;  %v410_v49 = vld [vmem:[%s1863_s4 + $0x260] sm:$0xff]  ;;  %v405_v52 = vld [vmem:[%s1863_s4 + $0x238] sm:$0xff] }
  0x47   : > { %704 = vmatpush2.msra.mxu0 %v544_v51  ;;  %648 = vmatprep.subr.mxu1 %v479_v3  ;;  %v403_v51 = vld [vmem:[%s1863_s4 + $0x228] sm:$0xff] }
  0x48   : > { %705 = vmatprep.subr.mxu0 %v537_v53  ;;  %649 = vmatpush2.msra.mxu1 %v478_v5  ;;  %v402_v53 = vld [vmem:[%s1863_s4 + $0x220] sm:$0xff]  ;;  %v371_v3 = vld [vmem:[%s1863_s4 + $0x128] sm:$0xff] }
  0x49   : > { %706 = vmatpush2.msra.mxu0 %v536_v54  ;;  %650 = vmatprep.subr.mxu1 %v471_v7  ;;  %v404_v54 = vld [vmem:[%s1863_s4 + $0x230] sm:$0xff]  ;;  %v370_v5 = vld [vmem:[%s1863_s4 + $0x120] sm:$0xff]  ;;  %v363_v7 = vld [vmem:[%s1863_s4 + $0xe8] sm:$0xff] }
  0x4a   : > { %707 = vmatprep.subr.mxu0 %v529_v55  ;;  %651 = vmatpush2.msra.mxu1 %v470_v9  ;;  %v395_v55 = vld [vmem:[%s1863_s4 + $0x1e8] sm:$0xff]  ;;  %v362_v9 = vld [vmem:[%s1863_s4 + $0xe0] sm:$0xff] }
  0x4b   : > { %708 = vmatpush2.msra.mxu0 %v528_v56  ;;  %652 = vmatprep.subr.mxu1 %v463_v11  ;;  %v397_v56 = vld [vmem:[%s1863_s4 + $0x1f8] sm:$0xff]  ;;  %v355_v11 = vld [vmem:[%s1863_s4 + $0xa8] sm:$0xff] }
  0x4c   : > { %709 = vmatprep.subr.mxu0 %v521_v57  ;;  %653 = vmatpush2.msra.mxu1 %v462_v13  ;;  %v394_v57 = vld [vmem:[%s1863_s4 + $0x1e0] sm:$0xff] }
  0x4d   : > { %710 = vmatpush2.msra.mxu0 %v520_v58  ;;  %732 = vmatprep.subr.mxu1 %v459_v15  ;;  %v396_v58 = vld [vmem:[%s1863_s4 + $0x1f0] sm:$0xff]  ;;  %v354_v13 = vld [vmem:[%s1863_s4 + $0xa0] sm:$0xff]  ;;  %v347_v15 = vld [vmem:[%s1863_s4 + $0x68] sm:$0xff] }
  0x4e   : > { %711 = vmatprep.subr.mxu0 %v513_v59  ;;  %v387_v59 = vld [vmem:[%s1863_s4 + $0x1a8] sm:$0xff] }
  0x4f   : > { %712 = vmatpush2.msra.mxu0 %v512_v60  ;;  %v389_v60 = vld [vmem:[%s1863_s4 + $0x1b8] sm:$0xff] }
  0x50   : > { %713 = vmatprep.subr.mxu0 %v505_v61  ;;  %v386_v61 = vld [vmem:[%s1863_s4 + $0x1a0] sm:$0xff] }
  0x51   : > { %714 = vmatpush2.msra.mxu0 %v504_v62  ;;  %v388_v62 = vld [vmem:[%s1863_s4 + $0x1b0] sm:$0xff] }
  0x52   : > { %715 = vmatprep.subr.mxu0 %v497_v63  ;;  %v379_v63 = vld [vmem:[%s1863_s4 + $0x168] sm:$0xff] }
  0x53   : > { %716 = vmatpush2.msra.mxu0 %v496_v0  ;;  %v381_v0 = vld [vmem:[%s1863_s4 + $0x178] sm:$0xff] }
  0x54   : > { %717 = vmatprep.subr.mxu0 %v489_v1  ;;  %v378_v1 = vld [vmem:[%s1863_s4 + $0x160] sm:$0xff] }
  0x55   : > { %718 = vmatpush2.msra.mxu0 %v488_v2  ;;  %v380_v2 = vld [vmem:[%s1863_s4 + $0x170] sm:$0xff] }
  0x56   : > { %719 = vmatprep.subr.mxu0 %v481_v4  ;;  %v373_v4 = vld [vmem:[%s1863_s4 + $0x138] sm:$0xff] }
  0x57   : > { %720 = vmatpush2.msra.mxu0 %v480_v6  ;;  %v372_v6 = vld [vmem:[%s1863_s4 + $0x130] sm:$0xff] }
  0x58   : > { %721 = vmatprep.subr.mxu0 %v473_v8  ;;  %v365_v8 = vld [vmem:[%s1863_s4 + $0xf8] sm:$0xff] }
  0x59   : > { %722 = vmatpush2.msra.mxu0 %v472_v10  ;;  %v364_v10 = vld [vmem:[%s1863_s4 + $0xf0] sm:$0xff] }
  0x5a   : > { %723 = vmatprep.subr.mxu0 %v465_v12  ;;  %v357_v12 = vld [vmem:[%s1863_s4 + $0xb8] sm:$0xff] }
  0x5b   : > { %724 = vmatpush2.msra.mxu0 %v464_v14  ;;  %v356_v14 = vld [vmem:[%s1863_s4 + $0xb0] sm:$0xff] }
  0x5c   : > { %803 = vmatprep.subr.mxu0 %v461_v16  ;;  %v349_v16 = vld [vmem:[%s1863_s4 + $0x78] sm:$0xff] }
  0x88   : > { %v322_v17 = vpop.permute.xlu0 %321 }
  0x8c   : > { %v330_v22 = vpop.permute.xlu0 %329 }
  0xdb   : > { %v313_v18 = vpop.f32.mrf.mxu0 }
  0xdc   : > { %v324_v19 = vmul.f32 %v322_v17, %v313_v18  ;;  %v348_v18 = vld [vmem:[%s1863_s4 + $0x70] sm:$0xff] }
  0xdd   : > { %v315_v20 = vpop.f32.mrf.mxu0 }
  0xde   : > { %v325_v21 = vmul.f32 %v322_v17, %v315_v20  ;;  %v1468_v24 = vadd.f32 %v330_v22, %v324_v19  ;;  %v346_v17 = vld [vmem:[%s1863_s4 + $0x60] sm:$0xff]  ;;  %v339_v19 = vld [vmem:[%s1863_s4 + $0x28] sm:$0xff]  ;;  %v341_v20 = vld [vmem:[%s1863_s4 + $0x38] sm:$0xff] }
  0xe0   : > { %v333_v23 = vadd.f32 %v330_v22, %v325_v21  ;;  %v338_v21 = vld [vmem:[%s1863_s4 + $0x20] sm:$0xff]  ;;  %v340_v22 = vld [vmem:[%s1863_s4 + $0x30] sm:$0xff] }
  0xe2   : > { %654 = vmatprep.mubr.f32.mxu1 %v333_v23  ;;  %725 = vmatprep.mubr.f32.mxu0 %v333_v23 }
  0xe3   : > { %655 = vmatmul.mubr.f32.vlgmr.msra.gmra.mxu1 %v1468_v24  ;;  %726 = vmatmul.mubr.f32.vlgmr.msra.gmra.mxu0 %v1468_v24 }
  0xe4   : > { %733 = vmatpush1.msra.mxu1 %v458_v25  ;;  %804 = vmatpush1.msra.mxu0 %v460_v26  ;;  %v589_v25 = vld [vmem:[%s1863_s4 + $0x7f8] sm:$0xff]  ;;  %v586_v26 = vld [vmem:[%s1863_s4 + $0x7e0] sm:$0xff] }
  0xe5   : > { %734 = vmatprep.subr.mxu1 %v451_v27  ;;  %796 = vmatprep.mubr.f32.mxu1 %v333_v23  ;;  %v588_v27 = vld [vmem:[%s1863_s4 + $0x7f0] sm:$0xff] }
  0xe6   : > { %805 = vmatprep.subr.mxu0 %v453_v28  ;;  %867 = vmatprep.mubr.f32.mxu0 %v333_v23  ;;  %v587_v23 = vld [vmem:[%s1863_s4 + $0x7e8] sm:$0xff] }
  0xe7   : > { %735 = vmatpush1.msra.mxu1 %v450_v29  ;;  %806 = vmatpush1.msra.mxu0 %v452_v30  ;;  %v579_v28 = vld [vmem:[%s1863_s4 + $0x7a8] sm:$0xff]  ;;  %v581_v29 = vld [vmem:[%s1863_s4 + $0x7b8] sm:$0xff]  ;;  %v578_v30 = vld [vmem:[%s1863_s4 + $0x7a0] sm:$0xff] }
  0xe8   : > { %736 = vmatprep.subr.mxu1 %v443_v31  ;;  %807 = vmatprep.subr.mxu0 %v445_v32  ;;  %v580_v31 = vld [vmem:[%s1863_s4 + $0x7b0] sm:$0xff]  ;;  %v571_v32 = vld [vmem:[%s1863_s4 + $0x768] sm:$0xff] }
  0xe9   : > { %737 = vmatpush1.msra.mxu1 %v442_v33  ;;  %808 = vmatpush1.msra.mxu0 %v444_v34  ;;  %v573_v33 = vld [vmem:[%s1863_s4 + $0x778] sm:$0xff]  ;;  %v570_v34 = vld [vmem:[%s1863_s4 + $0x760] sm:$0xff] }
  0xea   : > { %738 = vmatprep.subr.mxu1 %v435_v35  ;;  %809 = vmatprep.subr.mxu0 %v437_v36  ;;  %v572_v35 = vld [vmem:[%s1863_s4 + $0x770] sm:$0xff]  ;;  %v563_v36 = vld [vmem:[%s1863_s4 + $0x728] sm:$0xff] }
  0xeb   : > { %739 = vmatpush1.msra.mxu1 %v434_v37  ;;  %810 = vmatpush1.msra.mxu0 %v436_v38  ;;  %v565_v37 = vld [vmem:[%s1863_s4 + $0x738] sm:$0xff]  ;;  %v562_v38 = vld [vmem:[%s1863_s4 + $0x720] sm:$0xff] }
  0xec   : > { %740 = vmatprep.subr.mxu1 %v427_v39  ;;  %811 = vmatprep.subr.mxu0 %v429_v40  ;;  %v564_v39 = vld [vmem:[%s1863_s4 + $0x730] sm:$0xff]  ;;  %v555_v40 = vld [vmem:[%s1863_s4 + $0x6e8] sm:$0xff] }
  0xed   : > { %741 = vmatpush1.msra.mxu1 %v426_v41  ;;  %812 = vmatpush1.msra.mxu0 %v428_v42  ;;  %v557_v41 = vld [vmem:[%s1863_s4 + $0x6f8] sm:$0xff]  ;;  %v554_v42 = vld [vmem:[%s1863_s4 + $0x6e0] sm:$0xff] }
  0xee   : > { %742 = vmatprep.subr.mxu1 %v419_v43  ;;  %813 = vmatprep.subr.mxu0 %v421_v44  ;;  %v556_v43 = vld [vmem:[%s1863_s4 + $0x6f0] sm:$0xff]  ;;  %v547_v44 = vld [vmem:[%s1863_s4 + $0x6a8] sm:$0xff] }
  0xef   : > { %743 = vmatpush1.msra.mxu1 %v418_v45  ;;  %814 = vmatpush1.msra.mxu0 %v420_v46  ;;  %v549_v45 = vld [vmem:[%s1863_s4 + $0x6b8] sm:$0xff]  ;;  %v546_v46 = vld [vmem:[%s1863_s4 + $0x6a0] sm:$0xff] }
  0xf0   : > { %744 = vmatprep.subr.mxu1 %v411_v47  ;;  %815 = vmatprep.subr.mxu0 %v413_v48  ;;  %v548_v47 = vld [vmem:[%s1863_s4 + $0x6b0] sm:$0xff]  ;;  %v539_v48 = vld [vmem:[%s1863_s4 + $0x668] sm:$0xff] }
  0xf1   : > { %745 = vmatpush1.msra.mxu1 %v410_v49  ;;  %816 = vmatpush1.msra.mxu0 %v412_v50  ;;  %v541_v49 = vld [vmem:[%s1863_s4 + $0x678] sm:$0xff]  ;;  %v538_v50 = vld [vmem:[%s1863_s4 + $0x660] sm:$0xff] }
  0xf2   : > { %746 = vmatprep.subr.mxu1 %v403_v51  ;;  %817 = vmatprep.subr.mxu0 %v405_v52  ;;  %v540_v51 = vld [vmem:[%s1863_s4 + $0x670] sm:$0xff]  ;;  %v531_v52 = vld [vmem:[%s1863_s4 + $0x628] sm:$0xff] }
  0xf3   : > { %747 = vmatpush1.msra.mxu1 %v402_v53  ;;  %818 = vmatpush1.msra.mxu0 %v404_v54  ;;  %v533_v53 = vld [vmem:[%s1863_s4 + $0x638] sm:$0xff]  ;;  %v530_v54 = vld [vmem:[%s1863_s4 + $0x620] sm:$0xff] }
  0xf4   : > { %748 = vmatprep.subr.mxu1 %v395_v55  ;;  %819 = vmatprep.subr.mxu0 %v397_v56  ;;  %v532_v55 = vld [vmem:[%s1863_s4 + $0x630] sm:$0xff]  ;;  %v523_v56 = vld [vmem:[%s1863_s4 + $0x5e8] sm:$0xff] }
  0xf5   : > { %749 = vmatpush1.msra.mxu1 %v394_v57  ;;  %820 = vmatpush1.msra.mxu0 %v396_v58  ;;  %v525_v57 = vld [vmem:[%s1863_s4 + $0x5f8] sm:$0xff]  ;;  %v522_v58 = vld [vmem:[%s1863_s4 + $0x5e0] sm:$0xff] }
  0xf6   : > { %750 = vmatprep.subr.mxu1 %v387_v59  ;;  %821 = vmatprep.subr.mxu0 %v389_v60  ;;  %v524_v59 = vld [vmem:[%s1863_s4 + $0x5f0] sm:$0xff]  ;;  %v515_v60 = vld [vmem:[%s1863_s4 + $0x5a8] sm:$0xff] }
  0xf7   : > { %751 = vmatpush1.msra.mxu1 %v386_v61  ;;  %822 = vmatpush1.msra.mxu0 %v388_v62  ;;  %v517_v61 = vld [vmem:[%s1863_s4 + $0x5b8] sm:$0xff]  ;;  %v514_v62 = vld [vmem:[%s1863_s4 + $0x5a0] sm:$0xff] }
  0xf8   : > { %752 = vmatprep.subr.mxu1 %v379_v63  ;;  %823 = vmatprep.subr.mxu0 %v381_v0  ;;  %v516_v63 = vld [vmem:[%s1863_s4 + $0x5b0] sm:$0xff]  ;;  %v507_v0 = vld [vmem:[%s1863_s4 + $0x568] sm:$0xff] }
  0xf9   : > { %753 = vmatpush1.msra.mxu1 %v378_v1  ;;  %824 = vmatpush1.msra.mxu0 %v380_v2  ;;  %v509_v1 = vld [vmem:[%s1863_s4 + $0x578] sm:$0xff]  ;;  %v506_v2 = vld [vmem:[%s1863_s4 + $0x560] sm:$0xff] }
  0xfa   : > { %754 = vmatprep.subr.mxu1 %v371_v3  ;;  %825 = vmatprep.subr.mxu0 %v373_v4  ;;  %v508_v3 = vld [vmem:[%s1863_s4 + $0x570] sm:$0xff]  ;;  %v499_v4 = vld [vmem:[%s1863_s4 + $0x528] sm:$0xff] }
  0xfb   : > { %755 = vmatpush1.msra.mxu1 %v370_v5  ;;  %826 = vmatpush1.msra.mxu0 %v372_v6  ;;  %v501_v5 = vld [vmem:[%s1863_s4 + $0x538] sm:$0xff]  ;;  %v498_v6 = vld [vmem:[%s1863_s4 + $0x520] sm:$0xff] }
  0xfc   : > { %756 = vmatprep.subr.mxu1 %v363_v7  ;;  %827 = vmatprep.subr.mxu0 %v365_v8  ;;  %v500_v7 = vld [vmem:[%s1863_s4 + $0x530] sm:$0xff]  ;;  %v491_v8 = vld [vmem:[%s1863_s4 + $0x4e8] sm:$0xff] }
  0xfd   : > { %757 = vmatpush1.msra.mxu1 %v362_v9  ;;  %828 = vmatpush1.msra.mxu0 %v364_v10  ;;  %v493_v9 = vld [vmem:[%s1863_s4 + $0x4f8] sm:$0xff]  ;;  %v490_v10 = vld [vmem:[%s1863_s4 + $0x4e0] sm:$0xff] }
  0xfe   : > { %758 = vmatprep.subr.mxu1 %v355_v11  ;;  %829 = vmatprep.subr.mxu0 %v357_v12  ;;  %v492_v11 = vld [vmem:[%s1863_s4 + $0x4f0] sm:$0xff]  ;;  %v483_v12 = vld [vmem:[%s1863_s4 + $0x4a8] sm:$0xff] }
  0xff   : > { %759 = vmatpush1.msra.mxu1 %v354_v13  ;;  %830 = vmatpush1.msra.mxu0 %v356_v14  ;;  %v485_v13 = vld [vmem:[%s1863_s4 + $0x4b8] sm:$0xff]  ;;  %v482_v14 = vld [vmem:[%s1863_s4 + $0x4a0] sm:$0xff] }
 0x100   : > { %760 = vmatprep.subr.mxu1 %v347_v15  ;;  %831 = vmatprep.subr.mxu0 %v349_v16  ;;  %v484_v15 = vld [vmem:[%s1863_s4 + $0x4b0] sm:$0xff]  ;;  %v475_v16 = vld [vmem:[%s1863_s4 + $0x468] sm:$0xff] }
 0x101   : > { %761 = vmatpush1.msra.mxu1 %v346_v17  ;;  %832 = vmatpush1.msra.mxu0 %v348_v18  ;;  %v477_v17 = vld [vmem:[%s1863_s4 + $0x478] sm:$0xff]  ;;  %v474_v18 = vld [vmem:[%s1863_s4 + $0x460] sm:$0xff] }
 0x102   : > { %762 = vmatprep.subr.mxu1 %v339_v19  ;;  %833 = vmatprep.subr.mxu0 %v341_v20  ;;  %v476_v19 = vld [vmem:[%s1863_s4 + $0x470] sm:$0xff]  ;;  %v467_v20 = vld [vmem:[%s1863_s4 + $0x428] sm:$0xff] }
 0x103   : > { %763 = vmatpush1.msra.mxu1 %v338_v21  ;;  %834 = vmatpush1.msra.mxu0 %v340_v22  ;;  %v469_v21 = vld [vmem:[%s1863_s4 + $0x438] sm:$0xff]  ;;  %v466_v22 = vld [vmem:[%s1863_s4 + $0x420] sm:$0xff] }
 0x104   : > { %764 = vmatprep.subr.mxu1 %v587_v23  ;;  %835 = vmatprep.subr.mxu0 %v589_v25  ;;  %v468_v23 = vld [vmem:[%s1863_s4 + $0x430] sm:$0xff]  ;;  %v1012_v25 = vmov 1983009808  }
 0x105   : > { %765 = vmatpush2.msra.mxu1 %v586_v26  ;;  %836 = vmatpush2.msra.mxu0 %v588_v27  ;;  %v885_v26 = vunpack.c.l.s4 %v1012_v25  ;;  %v887_v27 = vlaneseq }
 0x106   : > { %766 = vmatprep.subr.mxu1 %v579_v28  ;;  %837 = vmatprep.subr.mxu0 %v581_v29 }
 0x107   : > { %767 = vmatpush2.msra.mxu1 %v578_v30  ;;  %838 = vmatpush2.msra.mxu0 %v580_v31  ;;  %v886_v28 = vunpack.c.0.s8 %v885_v26  ;;  %v888_v29 = vshrl.u32 %v887_v27, 7 }
 0x108   : > { %768 = vmatprep.subr.mxu1 %v571_v32  ;;  %839 = vmatprep.subr.mxu0 %v573_v33 }
 0x109   : > { %769 = vmatpush2.msra.mxu1 %v570_v34  ;;  %840 = vmatpush2.msra.mxu0 %v572_v35  ;;  %v889_v32 = vsub.s32 %v886_v28, %v888_v29 }
 0x10a   : > { %770 = vmatprep.subr.mxu1 %v563_v36  ;;  %841 = vmatprep.subr.mxu0 %v565_v37 }
 0x10b   : > { %771 = vmatpush2.msra.mxu1 %v562_v38  ;;  %842 = vmatpush2.msra.mxu0 %v564_v39 }
 0x10c   : > { %772 = vmatprep.subr.mxu1 %v555_v40  ;;  %843 = vmatprep.subr.mxu0 %v557_v41 }
 0x10d   : > { %773 = vmatpush2.msra.mxu1 %v554_v42  ;;  %844 = vmatpush2.msra.mxu0 %v556_v43 }
 0x10e   : > { %774 = vmatprep.subr.mxu1 %v547_v44  ;;  %845 = vmatprep.subr.mxu0 %v549_v45 }
 0x10f   : > { %775 = vmatpush2.msra.mxu1 %v546_v46  ;;  %846 = vmatpush2.msra.mxu0 %v548_v47 }
 0x110   : > { %776 = vmatprep.subr.mxu1 %v539_v48  ;;  %847 = vmatprep.subr.mxu0 %v541_v49 }
 0x111   : > { %777 = vmatpush2.msra.mxu1 %v538_v50  ;;  %848 = vmatpush2.msra.mxu0 %v540_v51 }
 0x112   : > { %778 = vmatprep.subr.mxu1 %v531_v52  ;;  %849 = vmatprep.subr.mxu0 %v533_v53 }
 0x113   : > { %779 = vmatpush2.msra.mxu1 %v530_v54  ;;  %850 = vmatpush2.msra.mxu0 %v532_v55 }
 0x114   : > { %780 = vmatprep.subr.mxu1 %v523_v56  ;;  %851 = vmatprep.subr.mxu0 %v525_v57 }
 0x115   : > { %781 = vmatpush2.msra.mxu1 %v522_v58  ;;  %852 = vmatpush2.msra.mxu0 %v524_v59 }
 0x116   : > { %782 = vmatprep.subr.mxu1 %v515_v60  ;;  %853 = vmatprep.subr.mxu0 %v517_v61 }
 0x117   : > { %783 = vmatpush2.msra.mxu1 %v514_v62  ;;  %854 = vmatpush2.msra.mxu0 %v516_v63 }
 0x118   : > { %784 = vmatprep.subr.mxu1 %v507_v0  ;;  %855 = vmatprep.subr.mxu0 %v509_v1 }
 0x119   : > { %785 = vmatpush2.msra.mxu1 %v506_v2  ;;  %856 = vmatpush2.msra.mxu0 %v508_v3 }
 0x11a   : > { %786 = vmatprep.subr.mxu1 %v499_v4  ;;  %857 = vmatprep.subr.mxu0 %v501_v5 }
 0x11b   : > { %787 = vmatpush2.msra.mxu1 %v498_v6  ;;  %858 = vmatpush2.msra.mxu0 %v500_v7 }
 0x11c   : > { %788 = vmatprep.subr.mxu1 %v491_v8  ;;  %859 = vmatprep.subr.mxu0 %v493_v9 }
 0x11d   : > { %789 = vmatpush2.msra.mxu1 %v490_v10  ;;  %860 = vmatpush2.msra.mxu0 %v492_v11 }
 0x11e   : > { %790 = vmatprep.subr.mxu1 %v483_v12  ;;  %861 = vmatprep.subr.mxu0 %v485_v13 }
 0x11f   : > { %791 = vmatpush2.msra.mxu1 %v482_v14  ;;  %862 = vmatpush2.msra.mxu0 %v484_v15 }
 0x120   : > { %792 = vmatprep.subr.mxu1 %v475_v16  ;;  %863 = vmatprep.subr.mxu0 %v477_v17 }
 0x121   : > { %793 = vmatpush2.msra.mxu1 %v474_v18  ;;  %864 = vmatpush2.msra.mxu0 %v476_v19 }
 0x122   : > { %794 = vmatprep.subr.mxu1 %v467_v20  ;;  %865 = vmatprep.subr.mxu0 %v469_v21 }
 0x123   : > { %795 = vmatpush2.msra.mxu1 %v466_v22  ;;  %866 = vmatpush2.msra.mxu0 %v468_v23 }
 0x124   : > { %797 = vmatmul.mubr.f32.vlgmr.msra.gmra.mxu1 %v1468_v24  ;;  %868 = vmatmul.mubr.f32.vlgmr.msra.gmra.mxu0 %v1468_v24 }
 0x1a3   : > { %v656_v30 = vpop.f32.mrf.mxu1  ;;  %v727_v31 = vpop.f32.mrf.mxu0 }
 0x1a5   : > { %v658_v33 = vpop.f32.mrf.mxu1  ;;  %v729_v34 = vpop.f32.mrf.mxu0 }
 0x1a6   : > { %v882_v35 = vcombine.low %v656_v30, %v658_v33  ;;  %v883_v36 = vcombine.low %v727_v31, %v729_v34 }
 0x1a8   : > { %v890_v37 = vrot.slane %v882_v35, %v889_v32  ;;  %v897_v38 = vrot.slane %v883_v36, %v889_v32 }
 0x1aa   : > { %v898_v24 = vcombine.low %v890_v37, %v897_v38 }
 0x1ac   : > { %918 = vst [vmem:[%s224_s14] sm:$0xff] %v898_v24 }
 0x1e4   : > { %v798_v39 = vpop.f32.mrf.mxu1  ;;  %v869_v40 = vpop.f32.mrf.mxu0 }
 0x1e6   : > { %v800_v41 = vpop.f32.mrf.mxu1  ;;  %v871_v42 = vpop.f32.mrf.mxu0 }
 0x1e7   : > { %v899_v43 = vcombine.low %v798_v39, %v800_v41  ;;  %v900_v44 = vcombine.low %v869_v40, %v871_v42 }
 0x1e9   : > { %v907_v45 = vrot.slane %v899_v43, %v889_v32  ;;  %v914_v46 = vrot.slane %v900_v44, %v889_v32 }
 0x1eb   : > { %v915_v47 = vcombine.low %v907_v45, %v914_v46 }
 0x1ed   : > { %919 = vst [vmem:[%s224_s14 + $0x8] sm:$0xff] %v915_v47 }
 0x1ee PF: > { %s15_s18 = sadd.s32 1, %s1008_s18  }
 0x1ef   : > { %p12_p4 = scmp.ge.s32.totalorder %s15_s18, 4  }
 0x1f1   :  { %14 = sbr.rel (!%p12_p4) target bundleno = 1 (0x1), region = 70 }

// kernel: ca_forward.7
= control target key start
LH: loop header
LB: loop body
LE: loop exit
PB: predicated region body
PF: predicated region fallthrough
CT: control target
= control target key end

     0   :  { %6 = vsyncpa [#allocation3], 0  ;;  %s2039_s0 = inlined_call_operand.vmem [shape: f32[2,4,32,32], index: 0, kind: input, shape index: {}]   ;;  %s2040_s1 = inlined_call_operand.hbm [shape: f32[2,4,32,32], index: 1, kind: output, shape index: {}]  }
   0x1   :  { %8 = vsyncpa [#allocation3 + $0x1], 0  ;;  %s1594_s6 = smov 0   ;;  %s1596_s7 = smov 0  }
   0x2   :  { %s1598_s8 = smov 0   ;;  %s1600_s9 = smov 0  }
   0x3 LB: > { %s1615_s10 = sadd.s32 4294967295, %s1579_s9   ;;  %s1176_s11 = sadd.s32 4294967294, %s1579_s9   ;;  %s1579_s9 = sphi %s1600_s9, %s2046_s9   ;;  %s1575_s8 = sphi %s1598_s8, %s2045_s8   ;;  %s1571_s7 = sphi %s1596_s7, %s2044_s7   ;;  %s1567_s6 = sphi %s1594_s6, %s2043_s6  }
   0x4   : > { %s1619_s12 = sadd.s32 1, %s1579_s9   ;;  %s47_s13 = sadd.s32 1, %s1575_s8 }
   0x5   : > { %s44_s14 = ssub.s32 %s1579_s9, %s1619_s12  ;;  %p57_p0 = scmp.ne.s32.totalorder %s1575_s8, %s1571_s7 }
   0x6   : > { %p45_p1 = scmp.eq.s32.totalorder %s44_s14, 0  ;;  %p58_p2 = scmp.eq.s32.totalorder %s1615_s10, 1 }
   0x7   : > { %p63_p3 = scmp.ne.s32.totalorder %s1571_s7, %s1567_s6  ;;  %p64_p4 = scmp.eq.s32.totalorder %s1176_s11, 1 }
   0x8   : > { %s1630_s15 = scalar_select %p45_p1, %s1575_s8, %s47_s13  }
   0x9   : > { %p1632_p5 = por %p58_p2, %p57_p0  ;;  %p1636_p6 = por %p64_p4, %p63_p3 }
   0xa   : > { %p1179_p7 = scmp.ge.s32.totalorder %s1579_s9, 1  ;;  %p90_p8 = scmp.lt.s32.totalorder %s1579_s9, 3 }
   0xc   : > { %p91_p9 = pnand %p1179_p7, %p90_p8 }
   0xd   : > { %p110_p10 = scmp.lt.s32.totalorder (!%p91_p9), %s1615_s10, 1  ;;  %s107_s23 = sand.u32 (!%p91_p9), 1, %s1571_s7  }
   0xe   : > { %94 = sbr.rel (%p91_p9) target bundleno = 786 (0x312), region = 24  ;;  %s1180_s24 = sshll.u32 (!%p91_p9), %s107_s23, 7 }
   0xf   : > { %s1954_s25 = scalar_lea.vmem (!%p91_p9), [#allocation2], %s1180_s24  ;;  %s1237_s26 = sshll.u32 (!%p91_p9), %s1615_s10, 11 }
  0x10   : > { %s1114_s27 = sshll.u32 (!%p91_p9), %s1954_s25, 4  ;;  %s1987_s30 = scalar_lea.hbm (!%p91_p9), %s2040_s1, %s1237_s26  ;;  %s1989_s27 = int_to_ptr.vmem [resolvable:$true] %s1114_s27 }
  0x11   : > { %s1999_s2 = scalar_lea.sflag (!%p91_p9), [#allocation3], %s107_s23  ;;  %s1519_s3 = scalar_lea.vmem (!%p91_p9), %s1989_s27, 2048 }
  0x12   : > { %p1520_p11 = scmp.ne.s32.totalorder (!%p91_p9), %s1989_s27, %s1519_s3  ;;  %s1581_s4 = smov (!%p91_p9), [#allocation2]  }
  0x13   : > { %s111_s18 = scalar_select %p110_p10, %s1615_s10, 1  ;;  %vm131_vm0 = vcmask 261120  }
  0x14   : > { %p1521_p12 = pnand %p1520_p11, %p1632_p5  ;;  %s1523_s5 = sshll.u32 %s1581_s4, 4  ;;  %s1524_s5 = int_to_ptr.vmem [resolvable:$false] %s1523_s5 }
  0x15   : > { %s1236_s19 = sshll.u32 %s111_s18, 7  ;;  %s1525_s10 = scalar_lea.vmem %s1524_s5, 4096 }
  0x16   : > { %s1647_s22 = scalar_lea.vmem %s2039_s0, %s1236_s19  ;;  %p1522_p13 = pneg %p1521_p12 }
  0x17   : > { %v1650_v0 = vld [vmem:[%s1647_s22 + $0x18] sm:$0xff]  ;;  %v1656_v2 = vld [vmem:[%s1647_s22 + $0x10] sm:$0xff]  ;;  %v1674_v4 = vld [vmem:[%s1647_s22] sm:$0xff]  ;;  %p1526_p0 = scmp.lt.s32.totalorder %s1989_s27, %s1524_s5  ;;  %p1527_p1 = scmp.lt.s32.totalorder %s1525_s10, %s1519_s3 }
  0x18   : > { %v1653_v1 = vld [vmem:[%s1647_s22 + $0x38] sm:$0xff]  ;;  %1302 = vmatprep.subr.msk.mxu0 %vm131_vm0, %v1650_v0  ;;  %v1663_v3 = vld [vmem:[%s1647_s22 + $0x30] sm:$0xff]  ;;  %v1677_v5 = vld [vmem:[%s1647_s22 + $0x20] sm:$0xff]  ;;  %1310 = vmatprep.mubr.msk.f32.mxu0 %vm131_vm0, %v1674_v4 }
  0x19   : > { %1316 = vmatprep.subr.msk.mxu1 %vm131_vm0, %v1653_v1  ;;  %1303 = vmatpush3.xpose.msk.msra.mxu0 %vm131_vm0, %v1650_v0  ;;  %v116_v6 = vld [vmem:[%s1647_s22 + $0x8] sm:$0xff]  ;;  %v1698_v8 = vld [vmem:[%s1647_s22 + $0x78] sm:$0xff]  ;;  %v1712_v10 = vld [vmem:[%s1647_s22 + $0x70] sm:$0xff]  ;;  %p1528_p2 = por %p1527_p1, %p1526_p0 }
  0x1a   : > { %1317 = vmatpush3.xpose.msk.msra.mxu1 %vm131_vm0, %v1653_v1  ;;  %1304 = vmatprep.subr.msk.mxu0 %vm131_vm0, %v1656_v2  ;;  %v120_v7 = vld [vmem:[%s1647_s22 + $0x28] sm:$0xff]  ;;  %v1701_v9 = vld [vmem:[%s1647_s22 + $0x58] sm:$0xff]  ;;  %v1715_v11 = vld [vmem:[%s1647_s22 + $0x50] sm:$0xff] }
  0x1b   : > { %1318 = vmatprep.subr.msk.mxu1 %vm131_vm0, %v1663_v3  ;;  %1324 = vmatprep.mubr.msk.f32.mxu1 %vm131_vm0, %v1677_v5  ;;  %v1730_v12 = vld [vmem:[%s1647_s22 + $0x68] sm:$0xff]  ;;  %v1750_v14 = vld [vmem:[%s1647_s22 + $0x60] sm:$0xff]  ;;  %p1529_p3 = pnand %p1528_p2, %p1522_p13 }
  0x1c   : > { %v1735_v13 = vld [vmem:[%s1647_s22 + $0x48] sm:$0xff]  ;;  %v1753_v15 = vld [vmem:[%s1647_s22 + $0x40] sm:$0xff] }
  0x1d   : > { %1305 = vmatpush3.xpose.msk.msra.mxu0 %vm131_vm0, %v1656_v2 }
  0x1e   : > { %1319 = vmatpush3.xpose.msk.msra.mxu1 %vm131_vm0, %v1663_v3  ;;  %1306 = vmatprep.subr.msk.mxu0 %vm131_vm0, %v116_v6 }
  0x1f   : > { %1320 = vmatprep.subr.msk.mxu1 %vm131_vm0, %v120_v7 }
  0x21   : > { %1307 = vmatpush3.xpose.msk.msra.mxu0 %vm131_vm0, %v116_v6 }
  0x22   : > { %1321 = vmatpush3.xpose.msk.msra.mxu1 %vm131_vm0, %v120_v7  ;;  %1308 = vmatprep.subr.msk.mxu0 %vm131_vm0, %v1674_v4 }
  0x23   : > { %1322 = vmatprep.subr.msk.mxu1 %vm131_vm0, %v1677_v5 }
  0x25   : > { %1309 = vmatpush3.xpose.msk.msra.mxu0 %vm131_vm0, %v1674_v4 }
  0x26   : > { %1323 = vmatpush3.xpose.msk.msra.mxu1 %vm131_vm0, %v1677_v5  ;;  %1330 = vmatprep.subr.msk.mxu0 %vm131_vm0, %v1701_v9 }
  0x27   : > { %1344 = vmatprep.subr.msk.mxu1 %vm131_vm0, %v1698_v8 }
  0x28   : > { %1311 = vmatmul.mubr.msk.f32.vlgmr.msra.gmra.mxu0 %vm131_vm0, %v116_v6 }
  0x29   : > { %1325 = vmatmul.mubr.msk.f32.vlgmr.msra.gmra.mxu1 %vm131_vm0, %v120_v7  ;;  %1331 = vmatpush3.xpose.msk.msra.mxu0 %vm131_vm0, %v1701_v9 }
  0x2a   : > { %1345 = vmatpush3.xpose.msk.msra.mxu1 %vm131_vm0, %v1698_v8  ;;  %1332 = vmatprep.subr.msk.mxu0 %vm131_vm0, %v1715_v11 }
  0x2b   : > { %1346 = vmatprep.subr.msk.mxu1 %vm131_vm0, %v1712_v10  ;;  %1327 = vmatprep.mubr.msk.f32.mxu1 %vm131_vm0, %v1663_v3 }
  0x2c   : > { %1313 = vmatprep.mubr.msk.f32.mxu0 %vm131_vm0, %v1656_v2 }
  0x2d   : > { %1328 = vmatmul.mubr.msk.f32.gmra.mxu1 %vm131_vm0, %v1653_v1  ;;  %1314 = vmatmul.mubr.msk.f32.gmra.mxu0 %vm131_vm0, %v1650_v0 }
  0x2e   : > { %1347 = vmatpush3.xpose.msk.msra.mxu1 %vm131_vm0, %v1712_v10  ;;  %1333 = vmatpush3.xpose.msk.msra.mxu0 %vm131_vm0, %v1715_v11 }
  0x2f   : > { %1348 = vmatprep.subr.msk.mxu1 %vm131_vm0, %v1730_v12  ;;  %1334 = vmatprep.subr.msk.mxu0 %vm131_vm0, %v1735_v13 }
  0x30   : > { %1352 = vmatprep.mubr.msk.f32.mxu1 %vm131_vm0, %v1750_v14  ;;  %1338 = vmatprep.mubr.msk.f32.mxu0 %vm131_vm0, %v1753_v15 }
  0x32   : > { %1349 = vmatpush3.xpose.msk.msra.mxu1 %vm131_vm0, %v1730_v12  ;;  %1335 = vmatpush3.xpose.msk.msra.mxu0 %vm131_vm0, %v1735_v13 }
  0x33   : > { %1350 = vmatprep.subr.msk.mxu1 %vm131_vm0, %v1750_v14  ;;  %1336 = vmatprep.subr.msk.mxu0 %vm131_vm0, %v1753_v15 }
  0x36   : > { %1351 = vmatpush3.xpose.msk.msra.mxu1 %vm131_vm0, %v1750_v14  ;;  %1337 = vmatpush3.xpose.msk.msra.mxu0 %vm131_vm0, %v1753_v15 }
  0x37   : > { %1358 = vmatprep.subr.mxu0 %v1650_v0  ;;  %1372 = vmatprep.subr.mxu1 %v1653_v1 }
  0x39   : > { %1353 = vmatmul.mubr.msk.f32.vlgmr.msra.gmra.mxu1 %vm131_vm0, %v1730_v12  ;;  %1339 = vmatmul.mubr.msk.f32.vlgmr.msra.gmra.mxu0 %vm131_vm0, %v1735_v13 }
  0x3a   : > { %1355 = vmatprep.mubr.msk.f32.mxu1 %vm131_vm0, %v1712_v10  ;;  %1341 = vmatprep.mubr.msk.f32.mxu0 %vm131_vm0, %v1715_v11 }
  0x3b   : > { %1359 = vmatpush3.msra.mxu0 %v1650_v0  ;;  %1373 = vmatpush3.msra.mxu1 %v1653_v1 }
  0x3c   : > { %1360 = vmatprep.subr.mxu0 %v1656_v2  ;;  %1374 = vmatprep.subr.mxu1 %v1663_v3 }
  0x3d   : > { %1356 = vmatmul.mubr.msk.f32.gmra.mxu1 %vm131_vm0, %v1698_v8  ;;  %1342 = vmatmul.mubr.msk.f32.gmra.mxu0 %vm131_vm0, %v1701_v9 }
  0x3e   : > { %1361 = vmatpush3.msra.mxu0 %v1656_v2  ;;  %1375 = vmatpush3.msra.mxu1 %v1663_v3 }
  0x3f   : > { %1362 = vmatprep.subr.mxu0 %v116_v6  ;;  %1376 = vmatprep.subr.mxu1 %v120_v7 }
  0x40   : > { %1363 = vmatpush3.msra.mxu0 %v116_v6  ;;  %1377 = vmatpush3.msra.mxu1 %v120_v7 }
  0x41   : > { %1364 = vmatprep.subr.mxu0 %v1674_v4  ;;  %1378 = vmatprep.subr.mxu1 %v1677_v5 }
  0x42   : > { %1365 = vmatpush3.msra.mxu0 %v1674_v4  ;;  %1379 = vmatpush3.msra.mxu1 %v1677_v5 }
  0x43   : > { %1386 = vmatprep.subr.mxu0 %v1701_v9  ;;  %1400 = vmatprep.subr.mxu1 %v1698_v8 }
  0xe8   : > { %v1312_v16 = vpop.f32.mrf.mxu0 }
  0xe9   : > { %v1326_v17 = vpop.f32.mrf.mxu1  ;;  %v523_v18 = vsel %vm131_vm0, %v1312_v16, -inf }
  0xea   : > { %524 = vmax.xlane.f32.xlu1 %v523_v18  ;;  %v210_v19 = vpop.f32.mrf.mxu0  ;;  %v535_v22 = vsel %vm131_vm0, %v1326_v17, -inf }
  0xeb   : > { %v307_v20 = vpop.f32.mrf.mxu1  ;;  %v520_v21 = vsel %vm131_vm0, %v210_v19, -inf }
  0xec   : > { %521 = vmax.xlane.f32.xlu0 %v520_v21  ;;  %v532_v25 = vsel %vm131_vm0, %v307_v20, -inf }
  0xed   : > { %v1329_v23 = vpop.f32.mrf.mxu1  ;;  %v1315_v24 = vpop.f32.mrf.mxu0 }
  0xee   : > { %536 = vmax.xlane.f32.xlu1 %v535_v22  ;;  %v541_v26 = vsel %vm131_vm0, %v1329_v23, -inf  ;;  %v529_v28 = vsel %vm131_vm0, %v1315_v24, -inf }
  0xef   : > { %v317_v27 = vpop.f32.mrf.mxu1  ;;  %v220_v30 = vpop.f32.mrf.mxu0 }
  0xf0   : > { %533 = vmax.xlane.f32.xlu0 %v532_v25  ;;  %v538_v29 = vsel %vm131_vm0, %v317_v27, -inf  ;;  %v526_v31 = vsel %vm131_vm0, %v220_v30, -inf }
  0xf2   : > { %542 = vmax.xlane.f32.xlu1 %v541_v26 }
  0xf4   : > { %530 = vmax.xlane.f32.xlu0 %v529_v28 }
  0xf6   : > { %539 = vmax.xlane.f32.xlu1 %v538_v29 }
  0xf8   : > { %527 = vmax.xlane.f32.xlu0 %v526_v31 }
  0xf9   : > { %v1354_v32 = vpop.f32.mrf.mxu1  ;;  %v1805_v33 = vpop.f32.mrf.mxu0 }
  0xfa   : > { %v559_v34 = vsel %vm131_vm0, %v1354_v32, -inf  ;;  %v547_v35 = vsel %vm131_vm0, %v1805_v33, -inf }
  0xfb   : > { %560 = vmax.xlane.f32.xlu1 %v559_v34  ;;  %v1810_v36 = vpop.f32.mrf.mxu1  ;;  %v1812_v37 = vpop.f32.mrf.mxu0 }
  0xfc   : > { %v556_v38 = vsel %vm131_vm0, %v1810_v36, -inf  ;;  %548 = vmax.xlane.f32.xlu0 %v547_v35  ;;  %v544_v43 = vsel %vm131_vm0, %v1812_v37, -inf }
  0xfd   : > { %v1816_v39 = vpop.f32.mrf.mxu1  ;;  %v1818_v40 = vpop.f32.mrf.mxu0 }
  0xfe   : > { %v565_v46 = vsel %vm131_vm0, %v1816_v39, -inf  ;;  %v553_v47 = vsel %vm131_vm0, %v1818_v40, -inf }
  0xff   : > { %557 = vmax.xlane.f32.xlu1 %v556_v38  ;;  %v1820_v41 = vpop.f32.mrf.mxu1  ;;  %v1822_v42 = vpop.f32.mrf.mxu0 }
 0x100   : > { %v562_v44 = vsel %vm131_vm0, %v1820_v41, -inf  ;;  %545 = vmax.xlane.f32.xlu0 %v544_v43  ;;  %v550_v45 = vsel %vm131_vm0, %v1822_v42, -inf }
 0x103   : > { %563 = vmax.xlane.f32.xlu1 %v562_v44 }
 0x104   : > { %551 = vmax.xlane.f32.xlu0 %v550_v45 }
 0x107   : > { %566 = vmax.xlane.f32.xlu1 %v565_v46 }
 0x108   : > { %554 = vmax.xlane.f32.xlu0 %v553_v47 }
 0x173   : > { %v525_v48 = vpop.xlane.xlu1 %524 }
 0x174   : > { %v569_v49 = vsub.f32 %v1312_v16, %v525_v48 }
 0x175   : > { %v522_v50 = vpop.xlane.xlu0 %521 }
 0x176   : > { %v586_v51 = vmul.f32 1.442695, %v569_v49  ;;  %v568_v52 = vsub.f32 %v210_v19, %v522_v50 }
 0x177   : > { %v537_v53 = vpop.xlane.xlu1 %536 }
 0x178   : > { %1455 = vpow2.f32 %v586_v51  ;;  %v584_v54 = vmul.f32 1.442695, %v568_v52  ;;  %v573_v55 = vsub.f32 %v1326_v17, %v537_v53 }
 0x179   : > { %v534_v56 = vpop.xlane.xlu0 %533 }
 0x17a   : > { %1457 = vpow2.f32 %v584_v54  ;;  %v594_v57 = vmul.f32 1.442695, %v573_v55  ;;  %v572_v58 = vsub.f32 %v307_v20, %v534_v56 }
 0x17b   : > { %v543_v59 = vpop.xlane.xlu1 %542 }
 0x17c   : > { %1459 = vpow2.f32 %v594_v57  ;;  %v592_v60 = vmul.f32 1.442695, %v572_v58  ;;  %v575_v61 = vsub.f32 %v1329_v23, %v543_v59 }
 0x17d   : > { %v531_v62 = vpop.xlane.xlu0 %530 }
 0x17e   : > { %1461 = vpow2.f32 %v592_v60  ;;  %v598_v63 = vmul.f32 1.442695, %v575_v61  ;;  %v571_v0 = vsub.f32 %v1315_v24, %v531_v62 }
 0x17f   : > { %v540_v1 = vpop.xlane.xlu1 %539 }
 0x180   : > { %v590_v2 = vmul.f32 1.442695, %v571_v0  ;;  %v574_v3 = vsub.f32 %v317_v27, %v540_v1  ;;  %1463 = vpow2.f32 %v598_v63 }
 0x181   : > { %v528_v4 = vpop.xlane.xlu0 %527 }
 0x182   : > { %1465 = vpow2.f32 %v590_v2  ;;  %v596_v5 = vmul.f32 1.442695, %v574_v3  ;;  %v570_v6 = vsub.f32 %v220_v30, %v528_v4 }
 0x184   : > { %v561_v7 = vpop.xlane.xlu1 %560  ;;  %v588_v16 = vmul.f32 1.442695, %v570_v6  ;;  %1467 = vpow2.f32 %v596_v5 }
 0x185   : > { %v581_v17 = vsub.f32 %v1354_v32, %v561_v7  ;;  %v1834_v18 = vpop.eup %1455  ;;  %v549_v19 = vpop.xlane.xlu0 %548 }
 0x186   : > { %1469 = vpow2.f32 %v588_v16  ;;  %v577_v21 = vsub.f32 %v1805_v33, %v549_v19  ;;  %v619_v22 = vsel %vm131_vm0, %v1834_v18, 0.0 }
 0x187   : > { %v610_v20 = vmul.f32 1.442695, %v581_v17  ;;  %v1839_v23 = vpop.eup %1457  ;;  %620 = vadd.xlane.f32.xlu0 %v619_v22 }
 0x188   : > { %v558_v24 = vpop.xlane.xlu1 %557  ;;  %v602_v25 = vmul.f32 1.442695, %v577_v21  ;;  %v616_v29 = vsel %vm131_vm0, %v1839_v23, 0.0 }
 0x189   : > { %v580_v26 = vsub.f32 %v1810_v36, %v558_v24  ;;  %v1842_v27 = vpop.eup %1459  ;;  %1471 = vpow2.f32 %v610_v20  ;;  %v546_v28 = vpop.xlane.xlu0 %545 }
 0x18a   : > { %1473 = vpow2.f32 %v602_v25  ;;  %v576_v31 = vsub.f32 %v1812_v37, %v546_v28  ;;  %v631_v32 = vsel %vm131_vm0, %v1842_v27, 0.0 }
 0x18b   : > { %v608_v30 = vmul.f32 1.442695, %v580_v26  ;;  %v1849_v33 = vpop.eup %1461  ;;  %632 = vadd.xlane.f32.xlu1 %v631_v32  ;;  %617 = vadd.xlane.f32.xlu0 %v616_v29 }
 0x18c   : > { %v564_v34 = vpop.xlane.xlu1 %563  ;;  %v600_v35 = vmul.f32 1.442695, %v576_v31  ;;  %v628_v37 = vsel %vm131_vm0, %v1849_v33, 0.0 }
 0x18d   : > { %v582_v36 = vsub.f32 %v1820_v41, %v564_v34  ;;  %1475 = vpow2.f32 %v608_v30  ;;  %v552_v38 = vpop.xlane.xlu0 %551  ;;  %v1852_v43 = vpop.eup %1463 }
 0x18e   : > { %1477 = vpow2.f32 %v600_v35  ;;  %v578_v45 = vsub.f32 %v1822_v42, %v552_v38  ;;  %v637_v53 = vsel %vm131_vm0, %v1852_v43, 0.0 }
 0x18f   : > { %v612_v44 = vmul.f32 1.442695, %v582_v36  ;;  %v1857_v46 = vpop.eup %1465  ;;  %629 = vadd.xlane.f32.xlu1 %v628_v37 }
 0x190   : > { %v567_v47 = vpop.xlane.xlu1 %566  ;;  %v604_v48 = vmul.f32 1.442695, %v578_v45  ;;  %v625_v41 = vsel %vm131_vm0, %v1857_v46, 0.0 }
 0x191   : > { %v583_v49 = vsub.f32 %v1816_v39, %v567_v47  ;;  %1479 = vpow2.f32 %v612_v44  ;;  %626 = vadd.xlane.f32.xlu0 %v625_v41  ;;  %v555_v50 = vpop.xlane.xlu0 %554  ;;  %v1862_v51 = vpop.eup %1467 }
 0x192   : > { %1481 = vpow2.f32 %v604_v48  ;;  %v579_v52 = vsub.f32 %v1818_v40, %v555_v50  ;;  %v634_v57 = vsel %vm131_vm0, %v1862_v51, 0.0 }
 0x193   : > { %v614_v42 = vmul.f32 1.442695, %v583_v49  ;;  %v1867_v54 = vpop.eup %1469  ;;  %638 = vadd.xlane.f32.xlu1 %v637_v53 }
 0x194   : > { %v606_v55 = vmul.f32 1.442695, %v579_v52  ;;  %v622_v39 = vsel %vm131_vm0, %v1867_v54, 0.0 }
 0x195   : > { %1483 = vpow2.f32 %v614_v42  ;;  %623 = vadd.xlane.f32.xlu0 %v622_v39 }
 0x196   : > { %v1871_v56 = vpop.eup %1471  ;;  %1485 = vpow2.f32 %v606_v55 }
 0x197   : > { %v1875_v58 = vpop.eup %1473  ;;  %635 = vadd.xlane.f32.xlu1 %v634_v57  ;;  %v655_v60 = vsel %vm131_vm0, %v1871_v56, 0.0 }
 0x198   : > { %v643_v40 = vsel %vm131_vm0, %v1875_v58, 0.0 }
 0x199   : > { %644 = vadd.xlane.f32.xlu0 %v643_v40 }
 0x19a   : > { %v1879_v59 = vpop.eup %1475 }
 0x19b   : > { %v1883_v61 = vpop.eup %1477  ;;  %656 = vadd.xlane.f32.xlu1 %v655_v60  ;;  %v652_v0 = vsel %vm131_vm0, %v1879_v59, 0.0 }
 0x19c   : > { %v640_v62 = vsel %vm131_vm0, %v1883_v61, 0.0 }
 0x19d   : > { %641 = vadd.xlane.f32.xlu0 %v640_v62 }
 0x19e   : > { %v1887_v63 = vpop.eup %1479 }
 0x19f   : > { %v1891_v1 = vpop.eup %1481  ;;  %653 = vadd.xlane.f32.xlu1 %v652_v0  ;;  %v658_v4 = vsel %vm131_vm0, %v1887_v63, 0.0 }
 0x1a0   : > { %v646_v2 = vsel %vm131_vm0, %v1891_v1, 0.0 }
 0x1a1   : > { %647 = vadd.xlane.f32.xlu0 %v646_v2 }
 0x1a2   : > { %v1895_v3 = vpop.eup %1483 }
 0x1a3   : > { %v1899_v5 = vpop.eup %1485  ;;  %659 = vadd.xlane.f32.xlu1 %v658_v4  ;;  %v661_v7 = vsel %vm131_vm0, %v1895_v3, 0.0 }
 0x1a4   : > { %v649_v6 = vsel %vm131_vm0, %v1899_v5, 0.0 }
 0x1a5   : > { %650 = vadd.xlane.f32.xlu0 %v649_v6 }
 0x1a7   : > { %662 = vadd.xlane.f32.xlu1 %v661_v7 }
 0x210   : > { %v621_v16 = vpop.xlane.xlu0 %620 }
 0x211   : > { %1487 = vrcp.f32 %v621_v16 }
 0x214   : > { %v633_v17 = vpop.xlane.xlu1 %632  ;;  %v618_v19 = vpop.xlane.xlu0 %617 }
 0x215   : > { %1489 = vrcp.f32 %v618_v19 }
 0x216   : > { %1491 = vrcp.f32 %v633_v17 }
 0x218   : > { %v630_v20 = vpop.xlane.xlu1 %629 }
 0x219   : > { %1493 = vrcp.f32 %v630_v20 }
 0x21a   : > { %v627_v21 = vpop.xlane.xlu0 %626 }
 0x21b   : > { %1495 = vrcp.f32 %v627_v21 }
 0x21c   : > { %v639_v22 = vpop.xlane.xlu1 %638 }
 0x21e   : > { %v624_v24 = vpop.xlane.xlu0 %623  ;;  %v1488_v26 = vpop.eup %1487 }
 0x21f   : > { %1497 = vrcp.f32 %v624_v24  ;;  %v681_v34 = vmul.f32 %v1488_v26, %v1834_v18 }
 0x220   : > { %1499 = vrcp.f32 %v639_v22  ;;  %v636_v25 = vpop.xlane.xlu1 %635 }
 0x221   : > { %1501 = vrcp.f32 %v636_v25 }
 0x222   : > { %v645_v28 = vpop.xlane.xlu0 %644  ;;  %v1490_v29 = vpop.eup %1489 }
 0x223   : > { %v680_v31 = vmul.f32 %v1490_v29, %v1839_v23  ;;  %v1492_v32 = vpop.eup %1491  ;;  %1503 = vrcp.f32 %v645_v28 }
 0x224   : > { %v657_v30 = vpop.xlane.xlu1 %656  ;;  %v685_v44 = vmul.f32 %v1492_v32, %v1842_v27 }
 0x225   : > { %1366 = vmatprep.mubr.msk.f32.mxu0 %vm131_vm0, %v680_v31 }
 0x226   : > { %v1494_v35 = vpop.eup %1493  ;;  %v642_v36 = vpop.xlane.xlu0 %641  ;;  %1367 = vmatmul.mubr.msk.f32.vlgmr.msra.gmra.mxu0 %vm131_vm0, %v681_v34 }
 0x227   : > { %1505 = vrcp.f32 %v642_v36  ;;  %v684_v38 = vmul.f32 %v1494_v35, %v1849_v33  ;;  %1387 = vmatpush3.msra.mxu0 %v1701_v9 }
 0x228   : > { %1507 = vrcp.f32 %v657_v30  ;;  %v654_v45 = vpop.xlane.xlu1 %653  ;;  %1388 = vmatprep.subr.mxu0 %v1715_v11  ;;  %v1496_v23 = vpop.eup %1495 }
 0x229   : > { %1509 = vrcp.f32 %v654_v45  ;;  %1380 = vmatprep.mubr.msk.f32.mxu1 %vm131_vm0, %v684_v38  ;;  %1389 = vmatpush3.msra.mxu0 %v1715_v11 }
 0x22a   : > { %1381 = vmatmul.mubr.msk.f32.vlgmr.msra.gmra.mxu1 %vm131_vm0, %v685_v44  ;;  %v648_v18 = vpop.xlane.xlu0 %647  ;;  %1390 = vmatprep.subr.mxu0 %v1735_v13 }
 0x22b   : > { %1511 = vrcp.f32 %v648_v18  ;;  %1401 = vmatpush3.msra.mxu1 %v1698_v8  ;;  %1391 = vmatpush3.msra.mxu0 %v1735_v13  ;;  %v683_v8 = vmul.f32 %v1496_v23, %v1857_v46 }
 0x22c   : > { %v1498_v27 = vpop.eup %1497  ;;  %v660_v33 = vpop.xlane.xlu1 %659  ;;  %1402 = vmatprep.subr.mxu1 %v1712_v10  ;;  %1392 = vmatprep.subr.mxu0 %v1753_v15 }
 0x22d   : > { %v1500_v9 = vpop.eup %1499  ;;  %1513 = vrcp.f32 %v660_v33  ;;  %v682_v37 = vmul.f32 %v1498_v27, %v1867_v54  ;;  %1403 = vmatpush3.msra.mxu1 %v1712_v10  ;;  %1393 = vmatpush3.msra.mxu0 %v1753_v15 }
 0x22e   : > { %v1502_v11 = vpop.eup %1501  ;;  %v651_v47 = vpop.xlane.xlu0 %650  ;;  %1404 = vmatprep.subr.mxu1 %v1730_v12  ;;  %v687_v10 = vmul.f32 %v1500_v9, %v1852_v43 }
 0x22f   : > { %1515 = vrcp.f32 %v651_v47  ;;  %1369 = vmatprep.mubr.msk.f32.mxu0 %vm131_vm0, %v682_v37  ;;  %v686_v13 = vmul.f32 %v1502_v11, %v1862_v51  ;;  %1405 = vmatpush3.msra.mxu1 %v1730_v12 }
 0x230   : > { %v663_v48 = vpop.xlane.xlu1 %662  ;;  %1370 = vmatmul.mubr.msk.f32.gmra.mxu0 %vm131_vm0, %v683_v8  ;;  %1406 = vmatprep.subr.mxu1 %v1750_v14  ;;  %v1504_v15 = vpop.eup %1503 }
 0x231   : > { %1517 = vrcp.f32 %v663_v48  ;;  %1383 = vmatprep.mubr.msk.f32.mxu1 %vm131_vm0, %v686_v13  ;;  %1407 = vmatpush3.msra.mxu1 %v1750_v14  ;;  %v689_v50 = vmul.f32 %v1504_v15, %v1875_v58 }
 0x232   : > { %1384 = vmatmul.mubr.msk.f32.gmra.mxu1 %vm131_vm0, %v687_v10 }
 0x234   : > { %v1506_v46 = vpop.eup %1505 }
 0x235   : > { %v1508_v49 = vpop.eup %1507  ;;  %v688_v41 = vmul.f32 %v1506_v46, %v1883_v61 }
 0x236   : > { %v1510_v12 = vpop.eup %1509  ;;  %v693_v42 = vmul.f32 %v1508_v49, %v1871_v56 }
 0x237   : > { %1394 = vmatprep.mubr.msk.f32.mxu0 %vm131_vm0, %v688_v41  ;;  %v692_v43 = vmul.f32 %v1510_v12, %v1879_v59 }
 0x238   : > { %v1512_v51 = vpop.eup %1511  ;;  %1395 = vmatmul.mubr.msk.f32.vlgmr.msra.gmra.mxu0 %vm131_vm0, %v689_v50 }
 0x239   : > { %1408 = vmatprep.mubr.msk.f32.mxu1 %vm131_vm0, %v692_v43  ;;  %v690_v14 = vmul.f32 %v1512_v51, %v1891_v1 }
 0x23a   : > { %v1514_v52 = vpop.eup %1513  ;;  %1409 = vmatmul.mubr.msk.f32.vlgmr.msra.gmra.mxu1 %vm131_vm0, %v693_v42 }
 0x23b   : > { %1397 = vmatprep.mubr.msk.f32.mxu0 %vm131_vm0, %v690_v14  ;;  %v694_v53 = vmul.f32 %v1514_v52, %v1887_v63 }
 0x23c   : > { %v1516_v54 = vpop.eup %1515 }
 0x23d   : > { %1411 = vmatprep.mubr.msk.f32.mxu1 %vm131_vm0, %v694_v53  ;;  %v691_v55 = vmul.f32 %v1516_v54, %v1899_v5 }
 0x23e   : > { %v1518_v39 = vpop.eup %1517 }
 0x23f   : > { %1398 = vmatmul.mubr.msk.f32.gmra.mxu0 %vm131_vm0, %v691_v55  ;;  %v695_v56 = vmul.f32 %v1518_v39, %v1895_v3 }
 0x241   : > { %1412 = vmatmul.mubr.msk.f32.gmra.mxu1 %vm131_vm0, %v695_v56 }
 0x2e6   : > { %v1368_v57 = vpop.f32.mrf.mxu0 }
 0x2e7   : > { %1085 = vst.msk [vmem:[%s1954_s25 + $0x8] sm:$0xff] %vm131_vm0, %v1368_v57 }
 0x2e8   : > { %v774_v58 = vpop.f32.mrf.mxu0 }
 0x2e9   : > { %1084 = vst.msk [vmem:[%s1954_s25] sm:$0xff] %vm131_vm0, %v774_v58 }
 0x2ea   : > { %v1382_v40 = vpop.f32.mrf.mxu1 }
 0x2eb   : > { %1089 = vst.msk [vmem:[%s1954_s25 + $0x28] sm:$0xff] %vm131_vm0, %v1382_v40 }
 0x2ec   : > { %v871_v59 = vpop.f32.mrf.mxu1 }
 0x2ed   : > { %1088 = vst.msk [vmem:[%s1954_s25 + $0x20] sm:$0xff] %vm131_vm0, %v871_v59 }
 0x2f0   : > { %v1371_v60 = vpop.f32.mrf.mxu0 }
 0x2f1   : > { %1087 = vst.msk [vmem:[%s1954_s25 + $0x18] sm:$0xff] %vm131_vm0, %v1371_v60 }
 0x2f2   : > { %v784_v61 = vpop.f32.mrf.mxu0  ;;  %v1385_v62 = vpop.f32.mrf.mxu1 }
 0x2f3   : > { %1086 = vst.msk [vmem:[%s1954_s25 + $0x10] sm:$0xff] %vm131_vm0, %v784_v61  ;;  %1091 = vst.msk [vmem:[%s1954_s25 + $0x38] sm:$0xff] %vm131_vm0, %v1385_v62 }
 0x2f4   : > { %v881_v63 = vpop.f32.mrf.mxu1 }
 0x2f5   : > { %1090 = vst.msk [vmem:[%s1954_s25 + $0x30] sm:$0xff] %vm131_vm0, %v881_v63 }
 0x2f8   : > { %v1396_v0 = vpop.f32.mrf.mxu0 }
 0x2f9   : > { %1093 = vst.msk [vmem:[%s1954_s25 + $0x48] sm:$0xff] %vm131_vm0, %v1396_v0 }
 0x2fa   : > { %v968_v1 = vpop.f32.mrf.mxu0  ;;  %v1410_v2 = vpop.f32.mrf.mxu1 }
 0x2fb   : > { %1092 = vst.msk [vmem:[%s1954_s25 + $0x40] sm:$0xff] %vm131_vm0, %v968_v1  ;;  %1097 = vst.msk [vmem:[%s1954_s25 + $0x68] sm:$0xff] %vm131_vm0, %v1410_v2 }
 0x2fc   : > { %v1065_v3 = vpop.f32.mrf.mxu1 }
 0x2fd   : > { %1096 = vst.msk [vmem:[%s1954_s25 + $0x60] sm:$0xff] %vm131_vm0, %v1065_v3 }
 0x2ff   : > { %v1399_v4 = vpop.f32.mrf.mxu0 }
 0x300   : > { %1095 = vst.msk [vmem:[%s1954_s25 + $0x58] sm:$0xff] %vm131_vm0, %v1399_v4 }
 0x301   : > { %v978_v5 = vpop.f32.mrf.mxu0  ;;  %v1413_v6 = vpop.f32.mrf.mxu1 }
 0x302   : > { %1094 = vst.msk [vmem:[%s1954_s25 + $0x50] sm:$0xff] %vm131_vm0, %v978_v5  ;;  %1099 = vst.msk [vmem:[%s1954_s25 + $0x78] sm:$0xff] %vm131_vm0, %v1413_v6 }
 0x303   : > { %v1075_v7 = vpop.f32.mrf.mxu1 }
 0x304   : > { %1098 = vst.msk [vmem:[%s1954_s25 + $0x70] sm:$0xff] %vm131_vm0, %v1075_v7 }
 0x305   : > { %1532 = shalt.err (!%p1529_p3)
}
 0x306   : > { %s1533_s11 = scalar_lea.hbm %s1987_s30, 2048  ;;  %s1537_s18 = scalar_lea.hbm %s2040_s1, 4096 }
 0x307   : > { %p1534_p4 = scmp.ne.s32.totalorder %s1987_s30, %s1533_s11  ;;  %p1538_p9 = scmp.lt.s32.totalorder %s1987_s30, %s2040_s1 }
 0x308   : > { %p1539_p10 = scmp.lt.s32.totalorder %s1537_s18, %s1533_s11 }
 0x309   : > { %p1535_p7 = pnand %p1534_p4, %p1632_p5 }
 0x30a   : > { %p1540_p11 = por %p1539_p10, %p1538_p9 }
 0x30b   : > { %p1536_p8 = pneg %p1535_p7 }
 0x30d   : > { %p1541_p12 = pnand %p1540_p11, %p1536_p8 }
 0x30f   : > { %1544 = shalt.err (!%p1541_p12)
}
 0x310   : > { %s1582_s21 = smov 128   ;;  %s1583_s22 = smov 8  }
 0x311   : > { %1414 = dma.vmem_to_hbm [thread:$0]  (%p1632_p5), %s1989_s27, 2048, %s1987_s30, %s1999_s2, %s1582_s21, %s1582_s21, %s1583_s22  }
 0x312 PF: > { %p1420_p13 = scmp.ge.s32.totalorder %s1579_s9, 2  ;;  %s1129_s23 = sand.u32 1, %s1567_s6  }
 0x313   : > { %s1130_s24 = scalar_lea.sflag [#allocation3], %s1129_s23 }
 0x314   : > { %p1417_p0 = pnand %p1420_p13, %p1636_p6 }
 0x316   : > { %p1418_p1 = pneg %p1417_p0 }
 0x318   : > { %1562 = dma.done.wait (%p1418_p1), %s1130_s24, 2048  }
 0x319   : > { %1564 = vsyncadd (%p1418_p1), %s1130_s24, 4294965248  ;;  %p11_p2 = scmp.ge.s32.totalorder %s1619_s12, 4   ;;  %s2043_s6 = smov %s1571_s7 }
 0x31a   : > { %s2044_s7 = smov %s1575_s8  ;;  %s2045_s8 = smov %s1630_s15 }
 0x31b   : > { %s2046_s9 = smov %s1619_s12  ;;  %13 = sbr.rel (!%p11_p2) target bundleno = 3 (0x3), region = 59 }
 0x320   :  { %1135 = vsyncpa [#allocation3], 1 }
 0x321   :  { %1137 = vsyncpa [#allocation3 + $0x1], 1 }

</bundles_post_ra>
